<compile_context>
chip_gen: v6e
topology: v6e:2x2x1
jax: 0.10.0
libtpu: 0.0.40
codegen_flags: <defaults>
</compile_context>

<pallas_src>
import math
from functools import partial

import jax
import jax.numpy as jnp
from jax import lax
from jax.experimental import pallas as pl
from jax.experimental.pallas import tpu as pltpu


def _make_flash_kernel(inv_scale, masked):
    def kernel(*refs):
        if masked:
            q_ref, k_ref, v_ref, m_ref, o_ref, m_scr, l_scr, acc_scr = refs
        else:
            q_ref, k_ref, v_ref, o_ref, m_scr, l_scr, acc_scr = refs
            m_ref = None

        ki = pl.program_id(2)

        @pl.when(ki == 0)
        def _init():
            m_scr[...] = jnp.full_like(m_scr, -jnp.inf)
            l_scr[...] = jnp.zeros_like(l_scr)
            acc_scr[...] = jnp.zeros_like(acc_scr)

        # Fold 1/sqrt(d_k) into Q (much cheaper than scaling the score tile).
        q = q_ref[0] * inv_scale                      # (tq, Dk)
        k = k_ref[0]                                  # (tk, Dk)

        # scores = Q @ K^T, contracting last dims of both -> no K transpose.
        s = lax.dot_general(
            q, k, (((1,), (1,)), ((), ())),
            preferred_element_type=jnp.float32)       # (tq, tk) f32

        if masked:
            # nonzero == keep, zero == masked_fill(-1e9) (PyTorch semantics).
            s = jnp.where(m_ref[0] != 0, s, jnp.float32(-1e9))

        # ---- online softmax update ----
        m_prev = m_scr[...]                                    # (tq, 1)
        m_new = jnp.maximum(m_prev, jnp.max(s, axis=-1, keepdims=True))
        alpha = jnp.exp(m_prev - m_new)
        p = jnp.exp(s - m_new)                                 # (tq, tk) f32
        l_scr[...] = alpha * l_scr[...] + jnp.sum(p, axis=-1, keepdims=True)
        acc_scr[...] = alpha * acc_scr[...] + jnp.dot(
            p.astype(v_ref.dtype), v_ref[0],
            preferred_element_type=jnp.float32)
        m_scr[...] = m_new

        @pl.when(ki == pl.num_programs(2) - 1)
        def _finalize():
            l = l_scr[...]
            r = pl.reciprocal(l, approx=True)   # EUP vrcp (free slot)
            r = r * (2.0 - l * r)               # one Newton step -> ~exact f32
            o_ref[0] = (acc_scr[...] * r).astype(o_ref.dtype)

    return kernel


def _pick_block(length, preferred, align):
    """Largest tile <= preferred that divides `length` and is `align`-aligned.

    Falls back to the full length (a single block is always a legal tile)."""
    if length <= preferred:
        return length
    t = (preferred // align) * align
    while t >= align:
        if length % t == 0:
            return t
        t -= align
    return length


def scaled_dot_product_attention(query, key, value, mask=None, *,
                                 query_key_dim=None,
                                 block_q=256, block_k=256):
    """query/key: (B, H, Lq/Lk, Dk), value: (B, H, Lk, Dv),
    mask: broadcastable to (B, H, Lq, Lk); True/nonzero == keep."""
    B, H, Lq, Dk = query.shape
    Lk = key.shape[2]
    Dv = value.shape[3]
    if query_key_dim is None:
        query_key_dim = Dk
    inv_scale = 1.0 / math.sqrt(float(query_key_dim))

    BH = B * H
    q = query.reshape(BH, Lq, Dk)
    k = key.reshape(BH, Lk, Dk)
    v = value.reshape(BH, Lk, Dv)

    # tq rows only need sublane (8) alignment; tk is the mask block's lane dim
    # so it needs 128 alignment (or the full Lk).
    tq = _pick_block(Lq, block_q, 8)
    tk = _pick_block(Lk, block_k, 128)

    grid = (BH, Lq // tq, Lk // tk)

    q_spec = pl.BlockSpec((1, tq, Dk), lambda b, qi, ki: (b, qi, 0))
    k_spec = pl.BlockSpec((1, tk, Dk), lambda b, qi, ki: (b, ki, 0))
    v_spec = pl.BlockSpec((1, tk, Dv), lambda b, qi, ki: (b, ki, 0))
    o_spec = pl.BlockSpec((1, tq, Dv), lambda b, qi, ki: (b, qi, 0))

    out_shape = jax.ShapeDtypeStruct((BH, Lq, Dv), query.dtype)
    scratch_shapes = [
        pltpu.VMEM((tq, 1), jnp.float32),   # running max m
        pltpu.VMEM((tq, 1), jnp.float32),   # running denom l
        pltpu.VMEM((tq, Dv), jnp.float32),  # running accumulator
    ]
    cparams = pltpu.CompilerParams(
        dimension_semantics=("parallel", "parallel", "arbitrary"))

    if mask is None:
        kernel = _make_flash_kernel(inv_scale, masked=False)
        out = pl.pallas_call(
            kernel,
            out_shape=out_shape,
            grid=grid,
            in_specs=[q_spec, k_spec, v_spec],
            out_specs=o_spec,
            scratch_shapes=scratch_shapes,
            compiler_params=cparams,
        )(q, k, v)
    else:
        # Keep mask at its original batch/head multiplicity (no B*H broadcast
        # in HBM); only broadcast the (cheap) seq dims and narrow to int8.
        if mask.ndim < 4:
            mask = mask.reshape((1,) * (4 - mask.ndim) + mask.shape)
        Bm, Hm = mask.shape[0], mask.shape[1]
        m = jnp.broadcast_to(mask, (Bm, Hm, Lq, Lk)).astype(jnp.int8)
        m = m.reshape(Bm * Hm, Lq, Lk)

        def m_index(b, qi, ki, Bm=Bm, Hm=Hm, H=H):
            bb = (b // H) if Bm > 1 else 0
            hh = (b % H) if Hm > 1 else 0
            return (bb * Hm + hh, qi, ki)

        m_spec = pl.BlockSpec((1, tq, tk), m_index)
        kernel = _make_flash_kernel(inv_scale, masked=True)
        out = pl.pallas_call(
            kernel,
            out_shape=out_shape,
            grid=grid,
            in_specs=[q_spec, k_spec, v_spec, m_spec],
            out_specs=o_spec,
            scratch_shapes=scratch_shapes,
            compiler_params=cparams,
        )(q, k, v, m)

    return out.reshape(B, H, Lq, Dv)


def _reference(query, key, value, mask=None):
    scale = math.sqrt(float(query.shape[-1]))
    s = jnp.einsum("bhqd,bhkd->bhqk", query, key,
                   precision=lax.Precision.HIGHEST) / scale
    if mask is not None:
        s = jnp.where(mask, s, -1e9)
    p = jax.nn.softmax(s, axis=-1)
    return jnp.einsum("bhqk,bhkd->bhqd", p, value,
                      precision=lax.Precision.HIGHEST)


if __name__ == "__main__":
    root = jax.random.PRNGKey(0)
    kq, kk, kv, km = jax.random.split(root, 4)

    # Small but large enough to exercise multi-step kv tiling (2 q-tiles x
    # 2 kv-tiles at block 128) and a head-broadcast mask.  Dv=128 keeps the
    # output store lane-dense.
    B, H, Lq, Lk, Dk, Dv = 2, 4, 256, 256, 64, 128
    query = jax.random.normal(kq, (B, H, Lq, Dk), dtype=jnp.float32)
    key = jax.random.normal(kk, (B, H, Lk, Dk), dtype=jnp.float32)
    value = jax.random.normal(kv, (B, H, Lk, Dv), dtype=jnp.float32)
    mask = jax.random.bernoulli(km, p=0.8, shape=(B, 1, Lq, Lk))

    # unmasked path
    out = scaled_dot_product_attention(query, key, value,
                                       block_q=128, block_k=128)
    out = jax.block_until_ready(out)
    ref = _reference(query, key, value)
    assert jnp.allclose(out, ref, atol=2e-4, rtol=2e-4), "unmasked mismatch"

    # masked path (head-broadcast mask, never materialized over H in HBM)
    out_m = scaled_dot_product_attention(query, key, value, mask,
                                         block_q=128, block_k=128)
    out_m = jax.block_until_ready(out_m)
    ref_m = _reference(query, key, value, mask)
    assert jnp.allclose(out_m, ref_m, atol=2e-4, rtol=2e-4), "masked mismatch"

    print("KERNEL_OK")
</pallas_src>

<mosaic_0001>
module attributes {stable_mosaic.version = 11 : i64} {
  func.func @kernel(%arg0: i32, %arg1: i32, %arg2: i32, %arg3: memref<1x128x64xf32, #tpu.memory_space<vmem>>, %arg4: memref<1x128x64xf32, #tpu.memory_space<vmem>>, %arg5: memref<1x128x128xf32, #tpu.memory_space<vmem>>, %arg6: memref<1x128x128xf32, #tpu.memory_space<vmem>>, %arg7: memref<128x1xf32, #tpu.memory_space<vmem>>, %arg8: memref<128x1xf32, #tpu.memory_space<vmem>>, %arg9: memref<128x128xf32, #tpu.memory_space<vmem>>) attributes {dimension_semantics = [#tpu.dimension_semantics<parallel>, #tpu.dimension_semantics<parallel>, #tpu.dimension_semantics<arbitrary>], iteration_bounds = array<i64: 8, 2, 2>, scalar_prefetch = 0 : i64, scratch_operands = 3 : i64, tpu.core_type = #tpu.core_type<tc>, window_params = [{transform_indices = @transform_0, window_bounds = array<i64: 1, 128, 64>}, {transform_indices = @transform_1, window_bounds = array<i64: 1, 128, 64>}, {transform_indices = @transform_2, window_bounds = array<i64: 1, 128, 128>}, {transform_indices = @transform_3, window_bounds = array<i64: 1, 128, 128>}]} {
    %c0_i32 = arith.constant 0 : i32
    %0 = arith.cmpi eq, %arg2, %c0_i32 : i32
    %1 = arith.extui %0 : i1 to i32
    %c0_i32_0 = arith.constant 0 : i32
    %2 = arith.cmpi ne, %1, %c0_i32_0 : i32
    scf.if %2 {
      %cst_26 = arith.constant 0xFF800000 : f32
      %37 = vector.broadcast %cst_26 : f32 to vector<128x1xf32>
      %c0_27 = arith.constant 0 : index
      %c0_28 = arith.constant 0 : index
      %38 = vector.load %arg7[%c0_27, %c0_28] : memref<128x1xf32, #tpu.memory_space<vmem>>, vector<128x1xf32>
      tpu.vector_store %arg7[%c0_27, %c0_28], %37 {strides = array<i32>} : memref<128x1xf32, #tpu.memory_space<vmem>>, vector<128x1xf32>,
      %cst_29 = arith.constant 0.000000e+00 : f32
      %39 = vector.broadcast %cst_29 : f32 to vector<128x1xf32>
      %c0_30 = arith.constant 0 : index
      %c0_31 = arith.constant 0 : index
      %40 = vector.load %arg8[%c0_30, %c0_31] : memref<128x1xf32, #tpu.memory_space<vmem>>, vector<128x1xf32>
      tpu.vector_store %arg8[%c0_30, %c0_31], %39 {strides = array<i32>} : memref<128x1xf32, #tpu.memory_space<vmem>>, vector<128x1xf32>,
      %cst_32 = arith.constant 0.000000e+00 : f32
      %41 = vector.broadcast %cst_32 : f32 to vector<128x128xf32>
      %c0_33 = arith.constant 0 : index
      %c0_34 = arith.constant 0 : index
      %42 = vector.load %arg9[%c0_33, %c0_34] : memref<128x128xf32, #tpu.memory_space<vmem>>, vector<128x128xf32>
      tpu.vector_store %arg9[%c0_33, %c0_34], %41 {strides = array<i32>} : memref<128x128xf32, #tpu.memory_space<vmem>>, vector<128x128xf32>,
    } else {
    }
    %c0 = arith.constant 0 : index
    %c0_1 = arith.constant 0 : index
    %c0_2 = arith.constant 0 : index
    %3 = vector.load %arg3[%c0, %c0_1, %c0_2] : memref<1x128x64xf32, #tpu.memory_space<vmem>>, vector<1x128x64xf32>
    %4 = vector.shape_cast %3 : vector<1x128x64xf32> to vector<128x64xf32>
    %cst = arith.constant 1.250000e-01 : f32
    %5 = vector.broadcast %cst : f32 to vector<128x64xf32>
    %6 = arith.mulf %4, %5 : vector<128x64xf32>
    %c0_3 = arith.constant 0 : index
    %c0_4 = arith.constant 0 : index
    %c0_5 = arith.constant 0 : index
    %7 = vector.load %arg4[%c0_3, %c0_4, %c0_5] : memref<1x128x64xf32, #tpu.memory_space<vmem>>, vector<1x128x64xf32>
    %8 = vector.shape_cast %7 : vector<1x128x64xf32> to vector<128x64xf32>
    %cst_6 = arith.constant dense<0.000000e+00> : vector<128x128xf32>
    %9 = tpu.matmul %6, %8, %cst_6 {dimension_numbers = #tpu.dot_dimension_numbers<[1], [1], [0], [0], [0, 0, 1, 0], [], []>} : vector<128x64xf32>, vector<128x64xf32>, vector<128x128xf32> -> vector<128x128xf32>
    %c0_7 = arith.constant 0 : index
    %c0_8 = arith.constant 0 : index
    %10 = vector.load %arg7[%c0_7, %c0_8] : memref<128x1xf32, #tpu.memory_space<vmem>>, vector<128x1xf32>
    %cst_9 = arith.constant dense<0xFF800000> : vector<128xf32>
    %11 = vector.multi_reduction <maximumf>, %9, %cst_9 [1] : vector<128x128xf32> to vector<128xf32>
    %12 = vector.shape_cast %11 : vector<128xf32> to vector<128x1xf32>
    %13 = arith.maximumf %10, %12 : vector<128x1xf32>
    %14 = arith.subf %10, %13 : vector<128x1xf32>
    %15 = math.exp %14 : vector<128x1xf32>
    %16 = vector.broadcast %13 : vector<128x1xf32> to vector<128x128xf32>
    %17 = arith.subf %9, %16 : vector<128x128xf32>
    %18 = math.exp %17 : vector<128x128xf32>
    %c0_10 = arith.constant 0 : index
    %c0_11 = arith.constant 0 : index
    %19 = vector.load %arg8[%c0_10, %c0_11] : memref<128x1xf32, #tpu.memory_space<vmem>>, vector<128x1xf32>
    %20 = arith.mulf %15, %19 : vector<128x1xf32>
    %cst_12 = arith.constant dense<0.000000e+00> : vector<128xf32>
    %21 = vector.multi_reduction <add>, %18, %cst_12 [1] : vector<128x128xf32> to vector<128xf32>
    %22 = vector.shape_cast %21 : vector<128xf32> to vector<128x1xf32>
    %23 = arith.addf %20, %22 : vector<128x1xf32>
    %c0_13 = arith.constant 0 : index
    %c0_14 = arith.constant 0 : index
    %24 = vector.load %arg8[%c0_13, %c0_14] : memref<128x1xf32, #tpu.memory_space<vmem>>, vector<128x1xf32>
    tpu.vector_store %arg8[%c0_13, %c0_14], %23 {strides = array<i32>} : memref<128x1xf32, #tpu.memory_space<vmem>>, vector<128x1xf32>,
    %c0_15 = arith.constant 0 : index
    %c0_16 = arith.constant 0 : index
    %25 = vector.load %arg9[%c0_15, %c0_16] : memref<128x128xf32, #tpu.memory_space<vmem>>, vector<128x128xf32>
    %26 = vector.broadcast %15 : vector<128x1xf32> to vector<128x128xf32>
    %27 = arith.mulf %26, %25 : vector<128x128xf32>
    %c0_17 = arith.constant 0 : index
    %c0_18 = arith.constant 0 : index
    %c0_19 = arith.constant 0 : index
    %28 = vector.load %arg5[%c0_17, %c0_18, %c0_19] : memref<1x128x128xf32, #tpu.memory_space<vmem>>, vector<1x128x128xf32>
    %29 = vector.shape_cast %28 : vector<1x128x128xf32> to vector<128x128xf32>
    %cst_20 = arith.constant dense<0.000000e+00> : vector<128x128xf32>
    %30 = tpu.matmul %18, %29, %cst_20 {dimension_numbers = #tpu.dot_dimension_numbers<[1], [0], [0], [1], [0, 0, 1, 1], [], []>} : vector<128x128xf32>, vector<128x128xf32>, vector<128x128xf32> -> vector<128x128xf32>
    %31 = arith.addf %27, %30 : vector<128x128xf32>
    %c0_21 = arith.constant 0 : index
    %c0_22 = arith.constant 0 : index
    %32 = vector.load %arg9[%c0_21, %c0_22] : memref<128x128xf32, #tpu.memory_space<vmem>>, vector<128x128xf32>
    tpu.vector_store %arg9[%c0_21, %c0_22], %31 {strides = array<i32>} : memref<128x128xf32, #tpu.memory_space<vmem>>, vector<128x128xf32>,
    %c0_23 = arith.constant 0 : index
    %c0_24 = arith.constant 0 : index
    %33 = vector.load %arg7[%c0_23, %c0_24] : memref<128x1xf32, #tpu.memory_space<vmem>>, vector<128x1xf32>
    tpu.vector_store %arg7[%c0_23, %c0_24], %13 {strides = array<i32>} : memref<128x1xf32, #tpu.memory_space<vmem>>, vector<128x1xf32>,
    %c1_i32 = arith.constant 1 : i32
    %34 = arith.cmpi eq, %arg2, %c1_i32 : i32
    %35 = arith.extui %34 : i1 to i32
    %c0_i32_25 = arith.constant 0 : i32
    %36 = arith.cmpi ne, %35, %c0_i32_25 : i32
    scf.if %36 {
      %c0_26 = arith.constant 0 : index
      %c0_27 = arith.constant 0 : index
      %37 = vector.load %arg8[%c0_26, %c0_27] : memref<128x1xf32, #tpu.memory_space<vmem>>, vector<128x1xf32>
      %38 = tpu.reciprocal %37 {approx = true} : vector<128x1xf32> -> vector<128x1xf32>
      %39 = arith.mulf %37, %38 : vector<128x1xf32>
      %cst_28 = arith.constant 2.000000e+00 : f32
      %40 = vector.broadcast %cst_28 : f32 to vector<128x1xf32>
      %41 = arith.subf %40, %39 : vector<128x1xf32>
      %42 = arith.mulf %38, %41 : vector<128x1xf32>
      %c0_29 = arith.constant 0 : index
      %c0_30 = arith.constant 0 : index
      %43 = vector.load %arg9[%c0_29, %c0_30] : memref<128x128xf32, #tpu.memory_space<vmem>>, vector<128x128xf32>
      %44 = vector.broadcast %42 : vector<128x1xf32> to vector<128x128xf32>
      %45 = arith.mulf %43, %44 : vector<128x128xf32>
      %c0_31 = arith.constant 0 : index
      %c0_32 = arith.constant 0 : index
      %c0_33 = arith.constant 0 : index
      %46 = vector.load %arg6[%c0_31, %c0_32, %c0_33] : memref<1x128x128xf32, #tpu.memory_space<vmem>>, vector<1x128x128xf32>
      %47 = vector.shape_cast %46 : vector<1x128x128xf32> to vector<128x128xf32>
      %48 = vector.shape_cast %45 : vector<128x128xf32> to vector<1x128x128xf32>
      tpu.vector_store %arg6[%c0_31, %c0_32, %c0_33], %48 {strides = array<i32>} : memref<1x128x128xf32, #tpu.memory_space<vmem>>, vector<1x128x128xf32>,
    } else {
    }
    return
  }
  func.func @transform_0(%arg0: i32, %arg1: i32, %arg2: i32) -> (i32, i32, i32) {
    %c0_i32 = arith.constant 0 : i32
    %c0_i32_0 = arith.constant 0 : i32
    return %arg0, %arg1, %c0_i32 : i32, i32, i32
  }
  func.func @transform_1(%arg0: i32, %arg1: i32, %arg2: i32) -> (i32, i32, i32) {
    %c0_i32 = arith.constant 0 : i32
    %c0_i32_0 = arith.constant 0 : i32
    return %arg0, %arg2, %c0_i32 : i32, i32, i32
  }
  func.func @transform_2(%arg0: i32, %arg1: i32, %arg2: i32) -> (i32, i32, i32) {
    %c0_i32 = arith.constant 0 : i32
    %c0_i32_0 = arith.constant 0 : i32
    return %arg0, %arg2, %c0_i32 : i32, i32, i32
  }
  func.func @transform_3(%arg0: i32, %arg1: i32, %arg2: i32) -> (i32, i32, i32) {
    %c0_i32 = arith.constant 0 : i32
    %c0_i32_0 = arith.constant 0 : i32
    return %arg0, %arg1, %c0_i32 : i32, i32, i32
  }
}

</mosaic_0001>

<bundles_post_ra>
// kernel: tpu_custom_call.1
= control target key start
LH: loop header
LB: loop body
LE: loop exit
PB: predicated region body
PF: predicated region fallthrough
CT: control target
= control target key end

     0   :  { %8 = vsyncpa [#allocation6], 0  ;;  %s2840_s0 = inlined_call_operand.vmem [shape: f32[8,256,64], index: 0, kind: input, shape index: {}]   ;;  %s2841_s1 = inlined_call_operand.vmem [shape: f32[8,256,64], index: 1, kind: input, shape index: {}]   ;;  %s2842_s2 = inlined_call_operand.vmem [shape: f32[8,256,128], index: 2, kind: input, shape index: {}]   ;;  %s2843_s3 = inlined_call_operand.hbm [shape: f32[8,256,128], index: 3, kind: output, shape index: {}]  }
   0x1   :  { %10 = vsyncpa [#allocation6 + $0x1], 0  ;;  %s2193_s12 = smov 0   ;;  %s2195_s13 = smov 0  }
   0x2   :  { %s2197_s14 = smov 0   ;;  %s2199_s15 = smov 0  }
   0x3   :  { %s2201_s16 = smov 0   ;;  %s2203_s17 = smov 0  }
   0x4   :  { %s2205_s18 = smov 0   ;;  %s2207_s19 = smov 0  }
   0x5   :  { %s2209_s20 = smov 0   ;;  %s2211_s21 = smov 0  }
   0x6 LB: > { %2850 = sst [smem:[#allocation8_spill]] %s2152_s18  ;;  %s1632_s22 = sadd.s32 4294967295, %s2164_s21   ;;  %s2164_s21 = sphi %s2211_s21, %s16_s21   ;;  %s2160_s20 = sphi %s2209_s20, %s2864_s20   ;;  %s2156_s19 = sphi %s2207_s19, %s2863_s19   ;;  %s2152_s18 = sphi %s2205_s18, %s2862_s18   ;;  %s2148_s17 = sphi %s2203_s17, %s2861_s17   ;;  %s2144_s16 = sphi %s2201_s16, %s2860_s16   ;;  %s2140_s15 = sphi %s2199_s15, %s2859_s15   ;;  %s2136_s14 = sphi %s2197_s14, %s2867_s14   ;;  %s2132_s13 = sphi %s2195_s13, %s2866_s13   ;;  %s2128_s12 = sphi %s2193_s12, %s2865_s12  }
   0x7   : > { %2851 = sst [smem:[#allocation9_spill]] %s2156_s19  ;;  %s1633_s23 = sadd.s32 4294967294, %s2164_s21  }
   0x8   : > { %2852 = sst [smem:[#allocation10_spill]] %s2160_s20  ;;  %s28_s24 = sadd.s32 1, %s2152_s18 }
   0x9   : > { %p29_p0 = scmp.ge.s32.totalorder %s28_s24, 2  ;;  %s31_s25 = sadd.s32 1, %s2156_s19 }
   0xa   : > { %s35_s26 = sadd.s32 1, %s2160_s20  ;;  %p138_p1 = scmp.ne.s32.totalorder %s2136_s14, %s2132_s13 }
   0xb   : > { %s2869_s24 = smov (%p29_p0, %s28_s24), 0  ;;  %s2871_s25 = smov (!%p29_p0, %s31_s25), %s2156_s19 }
   0xc   : > { %2853 = sst [smem:[#allocation11_spill]] %s2869_s24  ;;  %p139_p2 = scmp.eq.s32.totalorder %s1632_s22, 31 }
   0xd   : > { %p144_p3 = scmp.ne.s32.totalorder %s2132_s13, %s2128_s12  ;;  %p33_p4 = scmp.ge.s32.totalorder %s2871_s25, 2 }
   0xe   : > { %p145_p5 = scmp.eq.s32.totalorder %s1633_s23, 31  ;;  %p2255_p6 = por %p139_p2, %p138_p1 }
   0xf   : > { %s2873_s25 = smov (%p33_p4, %s2871_s25), 0  ;;  %s2875_s26 = smov (!%p33_p4, %s35_s26), %s2160_s20 }
  0x10   : > { %2855 = sst [smem:[#allocation12_spill]] %s2873_s25  ;;  %p2262_p7 = por %p145_p5, %p144_p3 }
  0x11   : > { %p1636_p8 = scmp.ge.s32.totalorder %s2164_s21, 1  ;;  %p37_p9 = scmp.ge.s32.totalorder %s2875_s26, 8 }
  0x12   : > { %p202_p10 = scmp.lt.s32.totalorder %s2164_s21, 33  ;;  %s124_s29 = ssub.s32 %s2156_s19, %s2873_s25 }
  0x13   : > { %s2877_s26 = smov (%p37_p9, %s2875_s26), 0  ;;  %s128_s5 = sadd.s32 1, %s2136_s14 }
  0x14   : > { %2857 = sst [smem:[#allocation13_spill]] %s2877_s26  ;;  %p203_p11 = pnand %p1636_p8, %p202_p10 }
  0x15   : > { %s123_s30 = ssub.s32 %s2160_s20, %s2877_s26  ;;  %s2847_s7 = sand.u32 (!%p203_p11), 1, %s2132_s13  }
  0x16   : > { %s125_s4 = sor.u32 %s124_s29, %s123_s30  ;;  %206 = sbr.rel (%p203_p11) target bundleno = 1053 (0x41d), region = 32 }
  0x17   : > { %p126_p12 = scmp.eq.s32.totalorder %s125_s4, 0  ;;  %s2280_s8 = sshll.u32 (!%p203_p11), %s2144_s16, 4 }
  0x18   : > { %s1637_s9 = sshll.u32 (!%p203_p11), %s2847_s7, 7  ;;  %p249_p13 = scmp.lt.s32.totalorder (!%p203_p11), %s2148_s17, 7 }
  0x19   : > { %s2276_s6 = scalar_select %p126_p12, %s2136_s14, %s128_s5  }
  0x1a   : > { %p251_p0 = scmp.lt.s32.totalorder (!%p203_p11), %s2280_s8, 31  ;;  %s1641_s23 = sshll.u32 (!%p203_p11), %s2140_s15, 4 }
  0x1b   : > { %s250_s10 = scalar_select %p249_p13, %s2148_s17, 7 }
  0x1c   : > { %s252_s11 = scalar_select %p251_p0, %s2280_s8, 31 }
  0x1d   : > { %s1639_s22 = sshll.u32 %s250_s10, 5  ;;  %p261_p1 = scmp.lt.s32.totalorder %s1641_s23, 31 }
  0x1e   : > { %s254_s29 = sadd.s32 %s1639_s22, %s252_s11  ;;  %s2304_s11 = scalar_lea.vmem [#allocation5], %s1637_s9 }
  0x1f   : > { %s1640_s30 = sshll.u32 %s254_s29, 3  ;;  %s2879_s23 = smov (!%p261_p1, %s1641_s23), 31 }
  0x20   : > { %s2292_s26 = scalar_lea.vmem %s2840_s0, %s1640_s30  ;;  %s264_s16 = sadd.s32 %s1639_s22, %s2879_s23 }
  0x21   : > { %s1643_s25 = sshll.u32 %s264_s16, 3  ;;  %p1647_p2 = scmp.ne.s32.totalorder %s2140_s15, 0 }
  0x22   : > { %s2297_s7 = scalar_lea.vmem %s2841_s1, %s1643_s25  ;;  %s2302_s10 = scalar_lea.vmem %s2842_s2, %s1643_s25 }
  0x23   : > { %282 = sbr.rel (%p1647_p2) target bundleno = 65 (0x41), region = 36 }
  0x28   : > { %vm283_vm0 = vcmask 7168   ;;  %v2166_v0 = vmov -inf   ;;  %v2167_v1 = vmov 0.0  }
  0x29   : > { %284 = vst.msk [vmem:[#allocation2] sm:$0xff] %vm283_vm0, %v2166_v0  ;;  %285 = vst.msk [vmem:[#allocation2 + $0x8] sm:$0xff] %vm283_vm0, %v2166_v0 }
  0x2a   : > { %286 = vst.msk [vmem:[#allocation2 + $0x10] sm:$0xff] %vm283_vm0, %v2166_v0  ;;  %287 = vst.msk [vmem:[#allocation2 + $0x18] sm:$0xff] %vm283_vm0, %v2166_v0 }
  0x2b   : > { %288 = vst.msk [vmem:[#allocation2 + $0x20] sm:$0xff] %vm283_vm0, %v2166_v0  ;;  %289 = vst.msk [vmem:[#allocation2 + $0x28] sm:$0xff] %vm283_vm0, %v2166_v0 }
  0x2c   : > { %290 = vst.msk [vmem:[#allocation2 + $0x30] sm:$0xff] %vm283_vm0, %v2166_v0  ;;  %291 = vst.msk [vmem:[#allocation2 + $0x38] sm:$0xff] %vm283_vm0, %v2166_v0 }
  0x2d   : > { %292 = vst.msk [vmem:[#allocation2 + $0x40] sm:$0xff] %vm283_vm0, %v2166_v0  ;;  %293 = vst.msk [vmem:[#allocation2 + $0x48] sm:$0xff] %vm283_vm0, %v2166_v0 }
  0x2e   : > { %294 = vst.msk [vmem:[#allocation2 + $0x50] sm:$0xff] %vm283_vm0, %v2166_v0  ;;  %295 = vst.msk [vmem:[#allocation2 + $0x58] sm:$0xff] %vm283_vm0, %v2166_v0 }
  0x2f   : > { %296 = vst.msk [vmem:[#allocation2 + $0x60] sm:$0xff] %vm283_vm0, %v2166_v0  ;;  %297 = vst.msk [vmem:[#allocation2 + $0x68] sm:$0xff] %vm283_vm0, %v2166_v0 }
  0x30   : > { %298 = vst.msk [vmem:[#allocation2 + $0x70] sm:$0xff] %vm283_vm0, %v2166_v0  ;;  %299 = vst.msk [vmem:[#allocation2 + $0x78] sm:$0xff] %vm283_vm0, %v2166_v0 }
  0x31   : > { %300 = vst.msk [vmem:[#allocation3] sm:$0xff] %vm283_vm0, %v2167_v1  ;;  %301 = vst.msk [vmem:[#allocation3 + $0x8] sm:$0xff] %vm283_vm0, %v2167_v1 }
  0x32   : > { %302 = vst.msk [vmem:[#allocation3 + $0x10] sm:$0xff] %vm283_vm0, %v2167_v1  ;;  %303 = vst.msk [vmem:[#allocation3 + $0x18] sm:$0xff] %vm283_vm0, %v2167_v1 }
  0x33   : > { %304 = vst.msk [vmem:[#allocation3 + $0x20] sm:$0xff] %vm283_vm0, %v2167_v1  ;;  %305 = vst.msk [vmem:[#allocation3 + $0x28] sm:$0xff] %vm283_vm0, %v2167_v1 }
  0x34   : > { %306 = vst.msk [vmem:[#allocation3 + $0x30] sm:$0xff] %vm283_vm0, %v2167_v1  ;;  %307 = vst.msk [vmem:[#allocation3 + $0x38] sm:$0xff] %vm283_vm0, %v2167_v1 }
  0x35   : > { %308 = vst.msk [vmem:[#allocation3 + $0x40] sm:$0xff] %vm283_vm0, %v2167_v1  ;;  %309 = vst.msk [vmem:[#allocation3 + $0x48] sm:$0xff] %vm283_vm0, %v2167_v1 }
  0x36   : > { %310 = vst.msk [vmem:[#allocation3 + $0x50] sm:$0xff] %vm283_vm0, %v2167_v1  ;;  %311 = vst.msk [vmem:[#allocation3 + $0x58] sm:$0xff] %vm283_vm0, %v2167_v1 }
  0x37   : > { %312 = vst.msk [vmem:[#allocation3 + $0x60] sm:$0xff] %vm283_vm0, %v2167_v1  ;;  %313 = vst.msk [vmem:[#allocation3 + $0x68] sm:$0xff] %vm283_vm0, %v2167_v1 }
  0x38   : > { %314 = vst.msk [vmem:[#allocation3 + $0x70] sm:$0xff] %vm283_vm0, %v2167_v1  ;;  %315 = vst.msk [vmem:[#allocation3 + $0x78] sm:$0xff] %vm283_vm0, %v2167_v1 }
  0x39   : > { %316 = vst [vmem:[#allocation4 + $0x30] sm:$0xff] %v2167_v1  ;;  %317 = vst [vmem:[#allocation4] sm:$0xff] %v2167_v1 }
  0x3a   : > { %318 = vst [vmem:[#allocation4 + $0x58] sm:$0xff] %v2167_v1  ;;  %319 = vst [vmem:[#allocation4 + $0x18] sm:$0xff] %v2167_v1 }
  0x3b   : > { %320 = vst [vmem:[#allocation4 + $0x50] sm:$0xff] %v2167_v1  ;;  %321 = vst [vmem:[#allocation4 + $0x68] sm:$0xff] %v2167_v1 }
  0x3c   : > { %322 = vst [vmem:[#allocation4 + $0x8] sm:$0xff] %v2167_v1  ;;  %323 = vst [vmem:[#allocation4 + $0x48] sm:$0xff] %v2167_v1 }
  0x3d   : > { %324 = vst [vmem:[#allocation4 + $0x40] sm:$0xff] %v2167_v1  ;;  %325 = vst [vmem:[#allocation4 + $0x20] sm:$0xff] %v2167_v1 }
  0x3e   : > { %326 = vst [vmem:[#allocation4 + $0x10] sm:$0xff] %v2167_v1  ;;  %327 = vst [vmem:[#allocation4 + $0x38] sm:$0xff] %v2167_v1 }
  0x3f   : > { %328 = vst [vmem:[#allocation4 + $0x60] sm:$0xff] %v2167_v1  ;;  %329 = vst [vmem:[#allocation4 + $0x70] sm:$0xff] %v2167_v1 }
  0x40   : > { %330 = vst [vmem:[#allocation4 + $0x78] sm:$0xff] %v2167_v1  ;;  %331 = vst [vmem:[#allocation4 + $0x28] sm:$0xff] %v2167_v1 }
  0x41 PF: > { %v379_v2 = vld [vmem:[%s2297_s7 + $0x78] sm:$0xff]  ;;  %vm380_vm1 = vcmask 523264   ;;  %v378_v3 = vld [vmem:[%s2297_s7 + $0x70] sm:$0xff]  ;;  %v377_v4 = vld [vmem:[%s2297_s7 + $0x68] sm:$0xff]  ;;  %v2168_v58 = vmov 0   ;;  %vm942_vm2 = vcmask 7168  }
  0x42   : > { %1751 = vmatprep.subr.msk.mxu0 %vm380_vm1, %v379_v2  ;;  %v332_v5 = vld [vmem:[%s2292_s26] sm:$0xff]  ;;  %v375_v8 = vld [vmem:[%s2297_s7 + $0x58] sm:$0xff]  ;;  %v374_v9 = vld [vmem:[%s2297_s7 + $0x50] sm:$0xff]  ;;  %1956 = vset.pattern.permute.xlu0 %v2168_v58  ;;  %p1680_p3 = scmp.ne.s32.totalorder %s2140_s15, 1 }
  0x43   : > { %1752 = vmatpush3.xpose.msk.msra.mxu0 %vm380_vm1, %v379_v2  ;;  %v348_v6 = vmul.f32 0.125, %v332_v5  ;;  %v376_v7 = vld [vmem:[%s2297_s7 + $0x60] sm:$0xff]  ;;  %v373_v10 = vld [vmem:[%s2297_s7 + $0x48] sm:$0xff]  ;;  %v371_v12 = vld [vmem:[%s2297_s7 + $0x38] sm:$0xff]  ;;  %1957 = vset.pattern.permute.xlu1 %v2168_v58 }
  0x44   : > { %1753 = vmatprep.subr.msk.mxu0 %vm380_vm1, %v378_v3  ;;  %v372_v11 = vld [vmem:[%s2297_s7 + $0x40] sm:$0xff]  ;;  %v370_v13 = vld [vmem:[%s2297_s7 + $0x30] sm:$0xff]  ;;  %v369_v14 = vld [vmem:[%s2297_s7 + $0x28] sm:$0xff] }
  0x45   : > { %1783 = vmatprep.mubr.msk.f32.mxu0 %vm380_vm1, %v348_v6  ;;  %v368_v15 = vld [vmem:[%s2297_s7 + $0x20] sm:$0xff]  ;;  %v367_v16 = vld [vmem:[%s2297_s7 + $0x18] sm:$0xff]  ;;  %v366_v17 = vld [vmem:[%s2297_s7 + $0x10] sm:$0xff] }
  0x46   : > { %v365_v18 = vld [vmem:[%s2297_s7 + $0x8] sm:$0xff]  ;;  %v364_v19 = vld [vmem:[%s2297_s7] sm:$0xff]  ;;  %v334_v21 = vld [vmem:[%s2292_s26 + $0x10] sm:$0xff] }
  0x47   : > { %1754 = vmatpush3.xpose.msk.msra.mxu0 %vm380_vm1, %v378_v3  ;;  %v333_v20 = vld [vmem:[%s2292_s26 + $0x8] sm:$0xff]  ;;  %v350_v23 = vmul.f32 0.125, %v334_v21  ;;  %v335_v24 = vld [vmem:[%s2292_s26 + $0x18] sm:$0xff]  ;;  %v336_v25 = vld [vmem:[%s2292_s26 + $0x20] sm:$0xff] }
  0x48   : > { %1755 = vmatprep.subr.msk.mxu0 %vm380_vm1, %v377_v4  ;;  %v349_v22 = vmul.f32 0.125, %v333_v20  ;;  %v351_v26 = vmul.f32 0.125, %v335_v24  ;;  %v352_v27 = vmul.f32 0.125, %v336_v25  ;;  %v337_v28 = vld [vmem:[%s2292_s26 + $0x28] sm:$0xff]  ;;  %v338_v29 = vld [vmem:[%s2292_s26 + $0x30] sm:$0xff]  ;;  %v339_v32 = vld [vmem:[%s2292_s26 + $0x38] sm:$0xff] }
  0x49   : > { %v353_v30 = vmul.f32 0.125, %v337_v28  ;;  %v354_v31 = vmul.f32 0.125, %v338_v29  ;;  %v340_v33 = vld [vmem:[%s2292_s26 + $0x40] sm:$0xff]  ;;  %v355_v34 = vmul.f32 0.125, %v339_v32  ;;  %v341_v36 = vld [vmem:[%s2292_s26 + $0x48] sm:$0xff]  ;;  %v342_v37 = vld [vmem:[%s2292_s26 + $0x50] sm:$0xff] }
  0x4a   : > { %v356_v35 = vmul.f32 0.125, %v340_v33  ;;  %v357_v38 = vmul.f32 0.125, %v341_v36  ;;  %v358_v39 = vmul.f32 0.125, %v342_v37  ;;  %v343_v40 = vld [vmem:[%s2292_s26 + $0x58] sm:$0xff]  ;;  %v344_v41 = vld [vmem:[%s2292_s26 + $0x60] sm:$0xff]  ;;  %v345_v44 = vld [vmem:[%s2292_s26 + $0x68] sm:$0xff] }
  0x4b   : > { %1756 = vmatpush3.xpose.msk.msra.mxu0 %vm380_vm1, %v377_v4  ;;  %v359_v42 = vmul.f32 0.125, %v343_v40  ;;  %v360_v43 = vmul.f32 0.125, %v344_v41  ;;  %v346_v45 = vld [vmem:[%s2292_s26 + $0x70] sm:$0xff]  ;;  %v361_v46 = vmul.f32 0.125, %v345_v44  ;;  %v347_v48 = vld [vmem:[%s2292_s26 + $0x78] sm:$0xff]  ;;  %v1084_v5 = vld [vmem:[%s2302_s10 + $0x68] sm:$0xff] }
  0x4c   : > { %1757 = vmatprep.subr.msk.mxu0 %vm380_vm1, %v376_v7  ;;  %v362_v47 = vmul.f32 0.125, %v346_v45  ;;  %v363_v49 = vmul.f32 0.125, %v347_v48  ;;  %v1086_v3 = vld [vmem:[%s2302_s10 + $0x78] sm:$0xff]  ;;  %v1085_v4 = vld [vmem:[%s2302_s10 + $0x70] sm:$0xff]  ;;  %v1083_v6 = vld [vmem:[%s2302_s10 + $0x60] sm:$0xff] }
  0x4d   : > { %1807 = vmatprep.subr.mxu1 %v1086_v3  ;;  %v1078_v20 = vld [vmem:[%s2302_s10 + $0x38] sm:$0xff]  ;;  %v1077_v24 = vld [vmem:[%s2302_s10 + $0x30] sm:$0xff]  ;;  %v1076_v28 = vld [vmem:[%s2302_s10 + $0x28] sm:$0xff] }
  0x4e   : > { %1808 = vmatpush3.msra.mxu1 %v1086_v3  ;;  %v1075_v32 = vld [vmem:[%s2302_s10 + $0x20] sm:$0xff]  ;;  %v1074_v36 = vld [vmem:[%s2302_s10 + $0x18] sm:$0xff]  ;;  %v1073_v40 = vld [vmem:[%s2302_s10 + $0x10] sm:$0xff] }
  0x4f   : > { %1758 = vmatpush3.xpose.msk.msra.mxu0 %vm380_vm1, %v376_v7  ;;  %1809 = vmatprep.subr.mxu1 %v1085_v4  ;;  %v1082_v7 = vld [vmem:[%s2302_s10 + $0x58] sm:$0xff]  ;;  %v1072_v45 = vld [vmem:[%s2302_s10 + $0x8] sm:$0xff]  ;;  %v2545_v48 = vld [vmem:[#allocation2 + $0x50] sm:$0xff] }
  0x50   : > { %1759 = vmatprep.subr.msk.mxu0 %vm380_vm1, %v375_v8  ;;  %1810 = vmatpush3.msra.mxu1 %v1085_v4 }
  0x51   : > { %1811 = vmatprep.subr.mxu1 %v1084_v5 }
  0x52   : > { %1812 = vmatpush3.msra.mxu1 %v1084_v5  ;;  %v633_v5 = vld [vmem:[#allocation2 + $0x58] sm:$0xff] }
  0x53   : > { %1760 = vmatpush3.xpose.msk.msra.mxu0 %vm380_vm1, %v375_v8  ;;  %1813 = vmatprep.subr.mxu1 %v1083_v6  ;;  %v2472_v8 = vld [vmem:[#allocation2] sm:$0xff] }
  0x54   : > { %1761 = vmatprep.subr.msk.mxu0 %vm380_vm1, %v374_v9  ;;  %1814 = vmatpush3.msra.mxu1 %v1083_v6 }
  0x55   : > { %1815 = vmatprep.subr.mxu1 %v1082_v7 }
  0x56   : > { %1816 = vmatpush3.msra.mxu1 %v1082_v7 }
  0x57   : > { %1762 = vmatpush3.xpose.msk.msra.mxu0 %vm380_vm1, %v374_v9  ;;  %v1081_v9 = vld [vmem:[%s2302_s10 + $0x50] sm:$0xff] }
  0x58   : > { %1763 = vmatprep.subr.msk.mxu0 %vm380_vm1, %v373_v10  ;;  %1817 = vmatprep.subr.mxu1 %v1081_v9 }
  0x59   : > { %1818 = vmatpush3.msra.mxu1 %v1081_v9 }
  0x5b   : > { %1764 = vmatpush3.xpose.msk.msra.mxu0 %vm380_vm1, %v373_v10 }
  0x5c   : > { %1765 = vmatprep.subr.msk.mxu0 %vm380_vm1, %v372_v11 }
  0x5f   : > { %1766 = vmatpush3.xpose.msk.msra.mxu0 %vm380_vm1, %v372_v11  ;;  %v2475_v11 = vld [vmem:[#allocation2 + $0x18] sm:$0xff] }
  0x60   : > { %1767 = vmatprep.subr.msk.mxu0 %vm380_vm1, %v371_v12 }
  0x63   : > { %1768 = vmatpush3.xpose.msk.msra.mxu0 %vm380_vm1, %v371_v12  ;;  %v1080_v12 = vld [vmem:[%s2302_s10 + $0x48] sm:$0xff] }
  0x64   : > { %1769 = vmatprep.subr.msk.mxu0 %vm380_vm1, %v370_v13  ;;  %1819 = vmatprep.subr.mxu1 %v1080_v12 }
  0x65   : > { %1820 = vmatpush3.msra.mxu1 %v1080_v12 }
  0x67   : > { %1770 = vmatpush3.xpose.msk.msra.mxu0 %vm380_vm1, %v370_v13 }
  0x68   : > { %1771 = vmatprep.subr.msk.mxu0 %vm380_vm1, %v369_v14 }
  0x6b   : > { %1772 = vmatpush3.xpose.msk.msra.mxu0 %vm380_vm1, %v369_v14 }
  0x6c   : > { %1773 = vmatprep.subr.msk.mxu0 %vm380_vm1, %v368_v15 }
  0x6f   : > { %1774 = vmatpush3.xpose.msk.msra.mxu0 %vm380_vm1, %v368_v15  ;;  %v2481_v15 = vld [vmem:[#allocation2 + $0x8] sm:$0xff] }
  0x70   : > { %1775 = vmatprep.subr.msk.mxu0 %vm380_vm1, %v367_v16 }
  0x73   : > { %1776 = vmatpush3.xpose.msk.msra.mxu0 %vm380_vm1, %v367_v16  ;;  %v1079_v16 = vld [vmem:[%s2302_s10 + $0x40] sm:$0xff] }
  0x74   : > { %1777 = vmatprep.subr.msk.mxu0 %vm380_vm1, %v366_v17  ;;  %1821 = vmatprep.subr.mxu1 %v1079_v16 }
  0x75   : > { %1822 = vmatpush3.msra.mxu1 %v1079_v16 }
  0x76   : > { %1823 = vmatprep.subr.mxu1 %v1078_v20 }
  0x77   : > { %1778 = vmatpush3.xpose.msk.msra.mxu0 %vm380_vm1, %v366_v17  ;;  %1824 = vmatpush3.msra.mxu1 %v1078_v20  ;;  %v2567_v20 = vld [vmem:[#allocation2 + $0x70] sm:$0xff] }
  0x78   : > { %1779 = vmatprep.subr.msk.mxu0 %vm380_vm1, %v365_v18  ;;  %1825 = vmatprep.subr.mxu1 %v1077_v24 }
  0x79   : > { %1826 = vmatpush3.msra.mxu1 %v1077_v24 }
  0x7a   : > { %1827 = vmatprep.subr.mxu1 %v1076_v28 }
  0x7b   : > { %1780 = vmatpush3.xpose.msk.msra.mxu0 %vm380_vm1, %v365_v18  ;;  %1828 = vmatpush3.msra.mxu1 %v1076_v28 }
  0x7c   : > { %1781 = vmatprep.subr.msk.mxu0 %vm380_vm1, %v364_v19  ;;  %1829 = vmatprep.subr.mxu1 %v1075_v32 }
  0x7d   : > { %1830 = vmatpush3.msra.mxu1 %v1075_v32 }
  0x7e   : > { %1831 = vmatprep.subr.mxu1 %v1074_v36 }
  0x7f   : > { %1782 = vmatpush3.xpose.msk.msra.mxu0 %vm380_vm1, %v364_v19  ;;  %v2490_v19 = vld [vmem:[#allocation2 + $0x10] sm:$0xff]  ;;  %1832 = vmatpush3.msra.mxu1 %v1074_v36 }
  0x80   : > { %1833 = vmatprep.subr.mxu1 %v1073_v40 }
  0x81   : > { %1834 = vmatpush3.msra.mxu1 %v1073_v40 }
  0x82   : > { %1784 = vmatmul.mubr.msk.f32.vlgmr.msra.gmra.mxu0 %vm380_vm1, %v349_v22  ;;  %1835 = vmatprep.subr.mxu1 %v1072_v45 }
  0x83   : > { %1786 = vmatprep.mubr.msk.f32.mxu0 %vm380_vm1, %v350_v23  ;;  %v2498_v23 = vld [vmem:[#allocation2 + $0x20] sm:$0xff]  ;;  %1836 = vmatpush3.msra.mxu1 %v1072_v45 }
  0x86   : > { %1787 = vmatmul.mubr.msk.f32.gmra.mxu0 %vm380_vm1, %v351_v26  ;;  %v2507_v26 = vld [vmem:[#allocation2 + $0x28] sm:$0xff] }
  0x87   : > { %1789 = vmatprep.mubr.msk.f32.mxu0 %vm380_vm1, %v352_v27 }
  0x8a   : > { %1790 = vmatmul.mubr.msk.f32.gmra.mxu0 %vm380_vm1, %v353_v30 }
  0x8b   : > { %1792 = vmatprep.mubr.msk.f32.mxu0 %vm380_vm1, %v354_v31  ;;  %v2515_v31 = vld [vmem:[#allocation2 + $0x30] sm:$0xff] }
  0x8e   : > { %1793 = vmatmul.mubr.msk.f32.gmra.mxu0 %vm380_vm1, %v355_v34  ;;  %v2522_v34 = vld [vmem:[#allocation2 + $0x38] sm:$0xff] }
  0x8f   : > { %1795 = vmatprep.mubr.msk.f32.mxu0 %vm380_vm1, %v356_v35 }
  0x92   : > { %1796 = vmatmul.mubr.msk.f32.gmra.mxu0 %vm380_vm1, %v357_v38 }
  0x93   : > { %1798 = vmatprep.mubr.msk.f32.mxu0 %vm380_vm1, %v358_v39  ;;  %v2529_v39 = vld [vmem:[#allocation2 + $0x40] sm:$0xff] }
  0x96   : > { %1799 = vmatmul.mubr.msk.f32.gmra.mxu0 %vm380_vm1, %v359_v42 }
  0x97   : > { %1801 = vmatprep.mubr.msk.f32.mxu0 %vm380_vm1, %v360_v43  ;;  %v2538_v43 = vld [vmem:[#allocation2 + $0x48] sm:$0xff] }
  0x9a   : > { %1802 = vmatmul.mubr.msk.f32.gmra.mxu0 %vm380_vm1, %v361_v46 }
  0x9b   : > { %1804 = vmatprep.mubr.msk.f32.mxu0 %vm380_vm1, %v362_v47 }
  0x9e   : > { %1805 = vmatmul.mubr.msk.f32.gmra.mxu0 %vm380_vm1, %v363_v49  ;;  %v1071_v49 = vld [vmem:[%s2302_s10] sm:$0xff] }
  0x9f   : > { %1837 = vmatprep.subr.mxu1 %v1071_v49 }
  0xa0   : > { %1838 = vmatpush3.msra.mxu1 %v1071_v49 }
 0x142   : > { %v2419_v50 = vpop.f32.mrf.mxu0 }
 0x144   : > { %v2421_v51 = vpop.f32.mrf.mxu0 }
 0x145   : > { %638 = vmax.xlane.f32.xlu0 %v2421_v51 }
 0x146   : > { %v2424_v52 = vpop.f32.mrf.mxu0 }
 0x147   : > { %644 = vmax.xlane.f32.xlu1 %v2424_v52 }
 0x148   : > { %v2427_v53 = vpop.f32.mrf.mxu0 }
 0x149   : > { %640 = vmax.xlane.f32.xlu0 %v2419_v50 }
 0x14a   : > { %v2430_v54 = vpop.f32.mrf.mxu0 }
 0x14b   : > { %642 = vmax.xlane.f32.xlu1 %v2427_v53 }
 0x14c   : > { %v2433_v55 = vpop.f32.mrf.mxu0 }
 0x14d   : > { %646 = vmax.xlane.f32.xlu0 %v2433_v55 }
 0x14e   : > { %v2436_v56 = vpop.f32.mrf.mxu0 }
 0x14f   : > { %648 = vmax.xlane.f32.xlu1 %v2430_v54 }
 0x150   : > { %v2439_v57 = vpop.f32.mrf.mxu0 }
 0x151   : > { %650 = vmax.xlane.f32.xlu0 %v2439_v57 }
 0x152   : > { %v2442_v59 = vpop.f32.mrf.mxu0 }
 0x153   : > { %652 = vmax.xlane.f32.xlu1 %v2436_v56 }
 0x154   : > { %v2445_v60 = vpop.f32.mrf.mxu0 }
 0x155   : > { %654 = vmax.xlane.f32.xlu0 %v2445_v60 }
 0x156   : > { %v2448_v61 = vpop.f32.mrf.mxu0 }
 0x157   : > { %656 = vmax.xlane.f32.xlu1 %v2442_v59 }
 0x158   : > { %v2451_v62 = vpop.f32.mrf.mxu0 }
 0x159   : > { %658 = vmax.xlane.f32.xlu0 %v2451_v62 }
 0x15a   : > { %v2454_v63 = vpop.f32.mrf.mxu0 }
 0x15b   : > { %660 = vmax.xlane.f32.xlu1 %v2448_v61 }
 0x15c   : > { %v2457_v0 = vpop.f32.mrf.mxu0 }
 0x15d   : > { %662 = vmax.xlane.f32.xlu0 %v2457_v0 }
 0x15e   : > { %v2460_v1 = vpop.f32.mrf.mxu0 }
 0x15f   : > { %664 = vmax.xlane.f32.xlu1 %v2454_v63 }
 0x160   : > { %v2463_v2 = vpop.f32.mrf.mxu0 }
 0x161   : > { %666 = vmax.xlane.f32.xlu0 %v2463_v2 }
 0x163   : > { %668 = vmax.xlane.f32.xlu1 %v2460_v1 }
 0x1ce   : > { %v639_v10 = vpop.xlane.xlu0 %638 }
 0x1cf   : > { %v2479_v13 = vmax.f32 %v2472_v8, %v639_v10  ;;  %v2558_v10 = vld [vmem:[#allocation2 + $0x60] sm:$0xff] }
 0x1d0   : > { %v645_v14 = vpop.xlane.xlu1 %644 }
 0x1d1   : > { %1264 = vst.msk [vmem:[#allocation2] sm:$0xff] %vm942_vm2, %v2479_v13  ;;  %v2487_v17 = vmax.f32 %v2475_v11, %v645_v14  ;;  %736 = vperm.xlu0 %1956, %v2479_v13   ;;  %v686_v41 = vsub.f32 %v2472_v8, %v2479_v13  ;;  %v635_v13 = vld [vmem:[#allocation2 + $0x68] sm:$0xff] }
 0x1d2   : > { %v641_v18 = vpop.xlane.xlu0 %640 }
 0x1d3   : > { %1267 = vst.msk [vmem:[#allocation2 + $0x18] sm:$0xff] %vm942_vm2, %v2487_v17  ;;  %v2496_v21 = vmax.f32 %v2481_v15, %v641_v18  ;;  %v702_v58 = vmul.f32 1.442695, %v686_v41  ;;  %v689_v3 = vsub.f32 %v2475_v11, %v2487_v17 }
 0x1d4   : > { %v643_v22 = vpop.xlane.xlu1 %642 }
 0x1d5   : > { %1265 = vst.msk [vmem:[#allocation2 + $0x8] sm:$0xff] %vm942_vm2, %v2496_v21  ;;  %v2504_v25 = vmax.f32 %v2490_v19, %v643_v22  ;;  %741 = vperm.xlu1 %1957, %v2496_v21   ;;  %1958 = vpow2.f32 %v702_v58  ;;  %v708_v11 = vmul.f32 1.442695, %v689_v3  ;;  %v687_v28 = vsub.f32 %v2481_v15, %v2496_v21 }
 0x1d6   : > { %v647_v27 = vpop.xlane.xlu0 %646 }
 0x1d7   : > { %1266 = vst.msk [vmem:[#allocation2 + $0x10] sm:$0xff] %vm942_vm2, %v2504_v25  ;;  %v2513_v29 = vmax.f32 %v2498_v23, %v647_v27  ;;  %1960 = vpow2.f32 %v708_v11  ;;  %v704_v15 = vmul.f32 1.442695, %v687_v28  ;;  %v688_v21 = vsub.f32 %v2490_v19, %v2504_v25 }
 0x1d8   : > { %v649_v30 = vpop.xlane.xlu1 %648 }
 0x1d9   : > { %v675_v33 = vmax.f32 %v2507_v26, %v649_v30  ;;  %751 = vperm.xlu1 %1957, %v2487_v17   ;;  %1268 = vst.msk [vmem:[#allocation2 + $0x20] sm:$0xff] %vm942_vm2, %v2513_v29  ;;  %v690_v19 = vsub.f32 %v2498_v23, %v2513_v29 }
 0x1da   : > { %v651_v35 = vpop.xlane.xlu0 %650 }
 0x1db   : > { %1269 = vst.msk [vmem:[#allocation2 + $0x28] sm:$0xff] %vm942_vm2, %v675_v33  ;;  %v2527_v37 = vmax.f32 %v2515_v31, %v651_v35  ;;  %v691_v8 = vsub.f32 %v2507_v26, %v675_v33  ;;  %v2572_v26 = vld [vmem:[#allocation2 + $0x78] sm:$0xff] }
 0x1dc   : > { %v653_v38 = vpop.xlane.xlu1 %652 }
 0x1dd   : > { %v677_v42 = vmax.f32 %v2522_v34, %v653_v38  ;;  %746 = vperm.xlu1 %1957, %v2504_v25   ;;  %1270 = vst.msk [vmem:[#allocation2 + $0x30] sm:$0xff] %vm942_vm2, %v2527_v37  ;;  %v712_v17 = vmul.f32 1.442695, %v691_v8  ;;  %v692_v49 = vsub.f32 %v2515_v31, %v2527_v37 }
 0x1de   : > { %v655_v44 = vpop.xlane.xlu0 %654 }
 0x1df   : > { %1271 = vst.msk [vmem:[#allocation2 + $0x38] sm:$0xff] %vm942_vm2, %v677_v42  ;;  %v2543_v46 = vmax.f32 %v2529_v39, %v655_v44  ;;  %v693_v22 = vsub.f32 %v2522_v34, %v677_v42  ;;  %1962 = vpow2.f32 %v712_v17 }
 0x1e0   : > { %v657_v47 = vpop.xlane.xlu1 %656 }
 0x1e1   : > { %v679_v4 = vmax.f32 %v2538_v43, %v657_v47  ;;  %761 = vperm.xlu1 %1957, %v675_v33   ;;  %1272 = vst.msk [vmem:[#allocation2 + $0x40] sm:$0xff] %vm942_vm2, %v2543_v46  ;;  %v716_v33 = vmul.f32 1.442695, %v693_v22  ;;  %v710_v47 = vmul.f32 1.442695, %v690_v19  ;;  %v694_v3 = vsub.f32 %v2529_v39, %v2543_v46 }
 0x1e2   : > { %v659_v6 = vpop.xlane.xlu0 %658 }
 0x1e3   : > { %1273 = vst.msk [vmem:[#allocation2 + $0x48] sm:$0xff] %vm942_vm2, %v679_v4  ;;  %781 = vperm.xlu0 %1956, %v679_v4   ;;  %v2555_v7 = vmax.f32 %v2545_v48, %v659_v6  ;;  %v695_v34 = vsub.f32 %v2538_v43, %v679_v4  ;;  %1964 = vpow2.f32 %v716_v33  ;;  %v706_v43 = vmul.f32 1.442695, %v688_v21 }
 0x1e4   : > { %v661_v9 = vpop.xlane.xlu1 %660  ;;  %1966 = vpow2.f32 %v704_v15  ;;  %v718_v31 = vmul.f32 1.442695, %v694_v3 }
 0x1e5   : > { %v681_v12 = vmax.f32 %v633_v5, %v661_v9  ;;  %756 = vperm.xlu1 %1957, %v2513_v29   ;;  %1274 = vst.msk [vmem:[#allocation2 + $0x50] sm:$0xff] %vm942_vm2, %v2555_v7  ;;  %v720_v40 = vmul.f32 1.442695, %v695_v34  ;;  %v714_v29 = vmul.f32 1.442695, %v692_v49 }
 0x1e6   : > { %v663_v14 = vpop.xlane.xlu0 %662 }
 0x1e7   : > { %1275 = vst.msk [vmem:[#allocation2 + $0x58] sm:$0xff] %vm942_vm2, %v681_v12  ;;  %791 = vperm.xlu0 %1956, %v681_v12   ;;  %v2565_v16 = vmax.f32 %v2558_v10, %v663_v14  ;;  %v697_v41 = vsub.f32 %v633_v5, %v681_v12  ;;  %1968 = vpow2.f32 %v720_v40 }
 0x1e8   : > { %v665_v18 = vpop.xlane.xlu1 %664  ;;  %1970 = vpow2.f32 %v706_v43 }
 0x1e9   : > { %v683_v24 = vmax.f32 %v635_v13, %v665_v18  ;;  %771 = vperm.xlu1 %1957, %v677_v42   ;;  %1276 = vst.msk [vmem:[#allocation2 + $0x60] sm:$0xff] %vm942_vm2, %v2565_v16  ;;  %v2597_v42 = vpop.eup %1958  ;;  %v724_v25 = vmul.f32 1.442695, %v697_v41 }
 0x1ea   : > { %v667_v27 = vpop.xlane.xlu0 %666  ;;  %v2603_v45 = vpop.eup %1960 }
 0x1eb   : > { %1277 = vst.msk [vmem:[#allocation2 + $0x68] sm:$0xff] %vm942_vm2, %v683_v24  ;;  %801 = vperm.xlu0 %1956, %v683_v24   ;;  %v2578_v30 = vmax.f32 %v2567_v20, %v667_v27  ;;  %v699_v44 = vsub.f32 %v635_v13, %v683_v24  ;;  %1972 = vpow2.f32 %v724_v25 }
 0x1ec   : > { %v669_v32 = vpop.xlane.xlu1 %668  ;;  %v2608_v58 = vpop.eup %1962  ;;  %1974 = vpow2.f32 %v710_v47 }
 0x1ed   : > { %v2582_v35 = vmax.f32 %v2572_v26, %v669_v32  ;;  %766 = vperm.xlu1 %1957, %v2527_v37   ;;  %v700_v36 = vsub.f32 %v2567_v20, %v2578_v30  ;;  %1278 = vst.msk [vmem:[#allocation2 + $0x70] sm:$0xff] %vm942_vm2, %v2578_v30  ;;  %v728_v23 = vmul.f32 1.442695, %v699_v44  ;;  %v696_v37 = vsub.f32 %v2545_v48, %v2555_v7 }
 0x1ef   : > { %v701_v38 = vsub.f32 %v2572_v26, %v2582_v35  ;;  %1279 = vst.msk [vmem:[#allocation2 + $0x78] sm:$0xff] %vm942_vm2, %v2582_v35  ;;  %811 = vperm.xlu0 %1956, %v2582_v35   ;;  %1976 = vpow2.f32 %v728_v23  ;;  %v722_v39 = vmul.f32 1.442695, %v696_v37 }
 0x1f0   : > { %v2615_v4 = vpop.eup %1964  ;;  %1978 = vpow2.f32 %v714_v29 }
 0x1f1   : > { %776 = vperm.xlu1 %1957, %v2543_v46   ;;  %v2620_v5 = vpop.eup %1966  ;;  %1980 = vpow2.f32 %v718_v31  ;;  %v698_v46 = vsub.f32 %v2558_v10, %v2565_v16 }
 0x1f2   : > { %1982 = vpow2.f32 %v722_v39 }
 0x1f3   : > { %977 = vperm.xlu0 %1956, %v2597_v42  }
 0x1f4   : > { %v2623_v6 = vpop.eup %1968 }
 0x1f5   : > { %786 = vperm.xlu1 %1957, %v2555_v7   ;;  %v2628_v8 = vpop.eup %1970  ;;  %v726_v7 = vmul.f32 1.442695, %v698_v46 }
 0x1f7   : > { %992 = vperm.xlu0 %1956, %v2603_v45   ;;  %1984 = vpow2.f32 %v726_v7 }
 0x1f8   : > { %v2631_v48 = vpop.eup %1972 }
 0x1f9   : > { %796 = vperm.xlu1 %1957, %v2565_v16   ;;  %v2634_v9 = vpop.eup %1974 }
 0x1fb   : > { %1002 = vperm.xlu0 %1956, %v2608_v58  }
 0x1fc   : > { %v2637_v11 = vpop.eup %1976 }
 0x1fd   : > { %806 = vperm.xlu1 %1957, %v2578_v30   ;;  %v2640_v10 = vpop.eup %1978 }
 0x1fe   : > { %v2643_v12 = vpop.eup %1980 }
 0x1ff   : > { %1012 = vperm.xlu0 %1956, %v2615_v4   ;;  %v2646_v13 = vpop.eup %1982 }
 0x201   : > { %982 = vperm.xlu1 %1957, %v2620_v5  }
 0x203   : > { %1022 = vperm.xlu0 %1956, %v2623_v6  }
 0x204   : > { %v2649_v14 = vpop.eup %1984 }
 0x205   : > { %987 = vperm.xlu1 %1957, %v2628_v8  }
 0x207   : > { %1032 = vperm.xlu0 %1956, %v2631_v48  }
 0x209   : > { %997 = vperm.xlu1 %1957, %v2634_v9  }
 0x20b   : > { %1042 = vperm.xlu0 %1956, %v2637_v11  }
 0x20d   : > { %1007 = vperm.xlu1 %1957, %v2640_v10  }
 0x211   : > { %1017 = vperm.xlu1 %1957, %v2643_v12  }
 0x215   : > { %1027 = vperm.xlu1 %1957, %v2646_v13  }
 0x219   : > { %1037 = vperm.xlu1 %1957, %v2649_v14  }
 0x24c   : > { %v737_v16 = vpop.permute.xlu0 %736 }
 0x24d   : > { %v814_v17 = vsub.f32 %v2421_v51, %v737_v16 }
 0x24f   : > { %v830_v18 = vmul.f32 1.442695, %v814_v17 }
 0x250   : > { %v742_v22 = vpop.permute.xlu1 %741 }
 0x251   : > { %1986 = vpow2.f32 %v830_v18  ;;  %v815_v24 = vsub.f32 %v2419_v50, %v742_v22 }
 0x253   : > { %v832_v27 = vmul.f32 1.442695, %v815_v24 }
 0x254   : > { %v752_v28 = vpop.permute.xlu1 %751 }
 0x255   : > { %1988 = vpow2.f32 %v832_v27  ;;  %v817_v32 = vsub.f32 %v2424_v52, %v752_v28 }
 0x257   : > { %v836_v33 = vmul.f32 1.442695, %v817_v32 }
 0x258   : > { %v747_v34 = vpop.permute.xlu1 %746 }
 0x259   : > { %1990 = vpow2.f32 %v836_v33  ;;  %v816_v15 = vsub.f32 %v2427_v53, %v747_v34 }
 0x25b   : > { %v834_v21 = vmul.f32 1.442695, %v816_v15 }
 0x25c   : > { %v762_v40 = vpop.permute.xlu1 %761 }
 0x25d   : > { %1992 = vpow2.f32 %v834_v21  ;;  %v819_v51 = vsub.f32 %v2430_v54, %v762_v40 }
 0x25e   : > { %v1987_v41 = vpop.eup %1986  ;;  %v782_v43 = vpop.permute.xlu0 %781 }
 0x25f   : > { %v840_v19 = vmul.f32 1.442695, %v819_v51  ;;  %894 = vadd.xlane.f32.xlu1 %v1987_v41  ;;  %1839 = vmatprep.mubr.f32.mxu1 %v1987_v41  ;;  %v823_v54 = vsub.f32 %v2442_v59, %v782_v43 }
 0x260   : > { %v757_v50 = vpop.permute.xlu1 %756 }
 0x261   : > { %1994 = vpow2.f32 %v840_v19  ;;  %v818_v25 = vsub.f32 %v2433_v55, %v757_v50  ;;  %v848_v39 = vmul.f32 1.442695, %v823_v54 }
 0x262   : > { %v1989_v52 = vpop.eup %1988  ;;  %v792_v47 = vpop.permute.xlu0 %791 }
 0x263   : > { %v838_v44 = vmul.f32 1.442695, %v818_v25  ;;  %896 = vadd.xlane.f32.xlu0 %v1989_v52  ;;  %1840 = vmatmul.mubr.f32.vlgmr.msra.gmra.mxu1 %v1989_v52  ;;  %v825_v46 = vsub.f32 %v2448_v61, %v792_v47  ;;  %v730_v52 = vmul.f32 1.442695, %v700_v36  ;;  %v732_v47 = vmul.f32 1.442695, %v701_v38 }
 0x264   : > { %v772_v53 = vpop.permute.xlu1 %771 }
 0x265   : > { %1996 = vpow2.f32 %v838_v44  ;;  %v821_v49 = vsub.f32 %v2436_v56, %v772_v53  ;;  %v852_v17 = vmul.f32 1.442695, %v825_v46 }
 0x266   : > { %v1991_v23 = vpop.eup %1990  ;;  %v802_v31 = vpop.permute.xlu0 %801 }
 0x267   : > { %v844_v29 = vmul.f32 1.442695, %v821_v49  ;;  %900 = vadd.xlane.f32.xlu1 %v1991_v23  ;;  %v827_v18 = vsub.f32 %v2454_v63, %v802_v31 }
 0x268   : > { %v767_v3 = vpop.permute.xlu1 %766 }
 0x269   : > { %1998 = vpow2.f32 %v844_v29  ;;  %v820_v37 = vsub.f32 %v2439_v57, %v767_v3  ;;  %v856_v28 = vmul.f32 1.442695, %v827_v18 }
 0x26a   : > { %v1993_v55 = vpop.eup %1992  ;;  %v812_v22 = vpop.permute.xlu0 %811 }
 0x26b   : > { %v842_v7 = vmul.f32 1.442695, %v820_v37  ;;  %898 = vadd.xlane.f32.xlu0 %v1993_v55  ;;  %1842 = vmatprep.mubr.f32.mxu1 %v1993_v55  ;;  %v829_v32 = vsub.f32 %v2460_v1, %v812_v22  ;;  %v865_v22 = vld [vmem:[#allocation3 + $0x18] sm:$0xff] }
 0x26c   : > { %v777_v16 = vpop.permute.xlu1 %776  ;;  %1843 = vmatmul.mubr.f32.gmra.mxu1 %v1991_v23 }
 0x26d   : > { %2000 = vpow2.f32 %v842_v7  ;;  %v822_v56 = vsub.f32 %v2445_v60, %v777_v16  ;;  %v860_v15 = vmul.f32 1.442695, %v829_v32 }
 0x26e   : > { %v1995_v59 = vpop.eup %1994  ;;  %2002 = vpow2.f32 %v848_v39  ;;  %v2682_v36 = vpop.permute.xlu0 %977  ;;  %v862_v39 = vld [vmem:[#allocation3] sm:$0xff] }
 0x26f   : > { %v846_v24 = vmul.f32 1.442695, %v822_v56  ;;  %904 = vadd.xlane.f32.xlu1 %v1995_v59  ;;  %v878_v46 = vmul.f32 %v2597_v42, %v862_v39  ;;  %v863_v56 = vld [vmem:[#allocation3 + $0x8] sm:$0xff]  ;;  %v872_v39 = vld [vmem:[#allocation3 + $0x50] sm:$0xff] }
 0x270   : > { %v787_v57 = vpop.permute.xlu1 %786 }
 0x271   : > { %2004 = vpow2.f32 %v846_v24  ;;  %v824_v61 = vsub.f32 %v2451_v62, %v787_v57  ;;  %v881_v57 = vmul.f32 %v2603_v45, %v865_v22 }
 0x272   : > { %v1997_v27 = vpop.eup %1996  ;;  %2006 = vpow2.f32 %v852_v17  ;;  %v2686_v23 = vpop.permute.xlu0 %992  ;;  %v879_v17 = vmul.f32 %v2620_v5, %v863_v56  ;;  %v888_v56 = vmul.f32 %v2646_v13, %v872_v39  ;;  %v876_v13 = vld [vmem:[#allocation3 + $0x70] sm:$0xff]  ;;  %v967_v39 = vld [vmem:[#allocation4 + $0x40] sm:$0xff] }
 0x273   : > { %v850_v33 = vmul.f32 1.442695, %v824_v61  ;;  %902 = vadd.xlane.f32.xlu0 %v1997_v27  ;;  %1845 = vmatprep.mubr.f32.mxu1 %v1997_v27  ;;  %v864_v27 = vld [vmem:[#allocation3 + $0x10] sm:$0xff] }
 0x274   : > { %v797_v60 = vpop.permute.xlu1 %796  ;;  %1846 = vmatmul.mubr.f32.gmra.mxu1 %v1995_v59  ;;  %v880_v42 = vmul.f32 %v2628_v8, %v864_v27 }
 0x275   : > { %2008 = vpow2.f32 %v850_v33  ;;  %v826_v63 = vsub.f32 %v2457_v0, %v797_v60  ;;  %v867_v33 = vld [vmem:[#allocation3 + $0x28] sm:$0xff] }
 0x276   : > { %v1999_v34 = vpop.eup %1998  ;;  %2010 = vpow2.f32 %v856_v28  ;;  %v2690_v26 = vpop.permute.xlu0 %1002  ;;  %v883_v5 = vmul.f32 %v2608_v58, %v867_v33 }
 0x277   : > { %v854_v21 = vmul.f32 1.442695, %v826_v63  ;;  %908 = vadd.xlane.f32.xlu1 %v1999_v34 }
 0x278   : > { %v807_v40 = vpop.permute.xlu1 %806 }
 0x279   : > { %2012 = vpow2.f32 %v854_v21  ;;  %v828_v62 = vsub.f32 %v2463_v2, %v807_v40  ;;  %v869_v40 = vld [vmem:[#allocation3 + $0x38] sm:$0xff] }
 0x27a   : > { %v2001_v51 = vpop.eup %2000  ;;  %2014 = vpow2.f32 %v860_v15  ;;  %v2694_v38 = vpop.permute.xlu0 %1012  ;;  %v885_v8 = vmul.f32 %v2615_v4, %v869_v40  ;;  %v962_v40 = vld [vmem:[#allocation4 + $0x18] sm:$0xff] }
 0x27b   : > { %v2003_v1 = vpop.eup %2002  ;;  %v858_v41 = vmul.f32 1.442695, %v828_v62  ;;  %906 = vadd.xlane.f32.xlu0 %v2001_v51  ;;  %1848 = vmatprep.mubr.f32.mxu1 %v2001_v51 }
 0x27c   : > { %912 = vadd.xlane.f32.xlu1 %v2003_v1  ;;  %1849 = vmatmul.mubr.f32.gmra.mxu1 %v1999_v34  ;;  %v2680_v30 = vpop.permute.xlu1 %982  ;;  %v866_v34 = vld [vmem:[#allocation3 + $0x20] sm:$0xff] }
 0x27d   : > { %2016 = vpow2.f32 %v858_v41  ;;  %v882_v45 = vmul.f32 %v2634_v9, %v866_v34 }
 0x27e   : > { %v2005_v43 = vpop.eup %2004  ;;  %2018 = vpow2.f32 %v730_v52  ;;  %v2698_v3 = vpop.permute.xlu0 %1022 }
 0x27f   : > { %v2007_v0 = vpop.eup %2006  ;;  %910 = vadd.xlane.f32.xlu0 %v2005_v43  ;;  %1851 = vmatprep.mubr.f32.mxu1 %v2005_v43  ;;  %2020 = vpow2.f32 %v732_v47  ;;  %v871_v43 = vld [vmem:[#allocation3 + $0x48] sm:$0xff] }
 0x280   : > { %916 = vadd.xlane.f32.xlu1 %v2007_v0  ;;  %1852 = vmatmul.mubr.f32.gmra.mxu1 %v2003_v1  ;;  %v2684_v49 = vpop.permute.xlu1 %987  ;;  %v868_v1 = vld [vmem:[#allocation3 + $0x30] sm:$0xff] }
 0x281   : > { %v884_v58 = vmul.f32 %v2640_v10, %v868_v1 }
 0x282   : > { %v2009_v19 = vpop.eup %2008  ;;  %v2702_v37 = vpop.permute.xlu0 %1032 }
 0x283   : > { %v2011_v50 = vpop.eup %2010  ;;  %914 = vadd.xlane.f32.xlu0 %v2009_v19  ;;  %1854 = vmatprep.mubr.f32.mxu1 %v2009_v19 }
 0x284   : > { %920 = vadd.xlane.f32.xlu1 %v2011_v50  ;;  %1855 = vmatmul.mubr.f32.gmra.mxu1 %v2007_v0  ;;  %v2688_v54 = vpop.permute.xlu1 %997  ;;  %v887_v0 = vmul.f32 %v2623_v6, %v871_v43 }
 0x286   : > { %v2013_v2 = vpop.eup %2012  ;;  %v2707_v7 = vpop.permute.xlu0 %1042 }
 0x287   : > { %v2015_v25 = vpop.eup %2014  ;;  %918 = vadd.xlane.f32.xlu0 %v2013_v2  ;;  %1857 = vmatprep.mubr.f32.mxu1 %v2013_v2 }
 0x288   : > { %924 = vadd.xlane.f32.xlu1 %v2015_v25  ;;  %1858 = vmatmul.mubr.f32.gmra.mxu1 %v2011_v50  ;;  %v2692_v35 = vpop.permute.xlu1 %1007  ;;  %v870_v50 = vld [vmem:[#allocation3 + $0x40] sm:$0xff] }
 0x289   : > { %v886_v4 = vmul.f32 %v2643_v12, %v870_v50  ;;  %v874_v12 = vld [vmem:[#allocation3 + $0x60] sm:$0xff] }
 0x28a   : > { %v2017_v44 = vpop.eup %2016 }
 0x28b   : > { %922 = vadd.xlane.f32.xlu0 %v2017_v44  ;;  %1860 = vmatprep.mubr.f32.mxu1 %v2017_v44  ;;  %v2674_v53 = vpop.eup %2018 }
 0x28c   : > { %1861 = vmatmul.mubr.f32.gmra.mxu1 %v2015_v25  ;;  %v2677_v20 = vpop.eup %2020  ;;  %v2696_v29 = vpop.permute.xlu1 %1017  ;;  %v873_v25 = vld [vmem:[#allocation3 + $0x58] sm:$0xff] }
 0x28d   : > { %v889_v44 = vmul.f32 %v2631_v48, %v873_v25  ;;  %v965_v25 = vld [vmem:[#allocation4 + $0x8] sm:$0xff] }
 0x290   : > { %v2700_v31 = vpop.permute.xlu1 %1027 }
 0x294   : > { %v2704_v55 = vpop.permute.xlu1 %1037 }
 0x299   : > { %1047 = vperm.xlu1 %1957, %v2674_v53  }
 0x2a1   : > { %1052 = vperm.xlu0 %1956, %v2677_v20  }
 0x2e8   : > { %v895_v16 = vpop.xlane.xlu1 %894 }
 0x2e9   : > { %v926_v59 = vadd.f32 %v895_v16, %v878_v46  ;;  %v875_v16 = vld [vmem:[#allocation3 + $0x68] sm:$0xff] }
 0x2eb   : > { %943 = vst.msk [vmem:[#allocation3] sm:$0xff] %vm942_vm2, %v926_v59  ;;  %v891_v59 = vmul.f32 %v2637_v11, %v875_v16  ;;  %v892_v11 = vmul.f32 %v2674_v53, %v876_v13  ;;  %v961_v53 = vld [vmem:[#allocation4 + $0x58] sm:$0xff] }
 0x2ec   : > { %v897_v18 = vpop.xlane.xlu0 %896 }
 0x2ed   : > { %v927_v24 = vadd.f32 %v897_v18, %v879_v17 }
 0x2ef   : > { %944 = vst.msk [vmem:[#allocation3 + $0x8] sm:$0xff] %vm942_vm2, %v927_v24  ;;  %v877_v24 = vld [vmem:[#allocation3 + $0x78] sm:$0xff] }
 0x2f0   : > { %v901_v61 = vpop.xlane.xlu1 %900 }
 0x2f1   : > { %v929_v28 = vadd.f32 %v901_v61, %v881_v57  ;;  %v890_v57 = vmul.f32 %v2649_v14, %v874_v12  ;;  %v893_v61 = vmul.f32 %v2677_v20, %v877_v24  ;;  %v960_v14 = vld [vmem:[#allocation4] sm:$0xff] }
 0x2f2   : > { %v971_v24 = vld [vmem:[#allocation4 + $0x60] sm:$0xff] }
 0x2f3   : > { %946 = vst.msk [vmem:[#allocation3 + $0x18] sm:$0xff] %vm942_vm2, %v929_v28 }
 0x2f4   : > { %v899_v32 = vpop.xlane.xlu0 %898 }
 0x2f5   : > { %v928_v60 = vadd.f32 %v899_v32, %v880_v42 }
 0x2f7   : > { %945 = vst.msk [vmem:[#allocation3 + $0x10] sm:$0xff] %vm942_vm2, %v928_v60 }
 0x2f8   : > { %v905_v63 = vpop.xlane.xlu1 %904 }
 0x2f9   : > { %v931_v15 = vadd.f32 %v905_v63, %v883_v5  ;;  %v959_v5 = vld [vmem:[#allocation4 + $0x30] sm:$0xff]  ;;  %v1056_v63 = vmul.f32 %v2680_v30, %v960_v14  ;;  %v964_v30 = vld [vmem:[#allocation4 + $0x68] sm:$0xff] }
 0x2fa   : > { %v1055_v34 = vmul.f32 %v2682_v36, %v959_v5  ;;  %v1060_v36 = vmul.f32 %v2690_v26, %v964_v30 }
 0x2fb   : > { %948 = vst.msk [vmem:[#allocation3 + $0x28] sm:$0xff] %vm942_vm2, %v931_v15 }
 0x2fc   : > { %v903_v21 = vpop.xlane.xlu0 %902 }
 0x2fd   : > { %v930_v62 = vadd.f32 %v903_v21, %v882_v45 }
 0x2ff   : > { %947 = vst.msk [vmem:[#allocation3 + $0x20] sm:$0xff] %vm942_vm2, %v930_v62  ;;  %v1058_v62 = vmul.f32 %v2686_v23, %v962_v40  ;;  %v966_v23 = vld [vmem:[#allocation4 + $0x48] sm:$0xff] }
 0x300   : > { %v909_v51 = vpop.xlane.xlu1 %908 }
 0x301   : > { %v933_v41 = vadd.f32 %v909_v51, %v885_v8  ;;  %v1057_v51 = vmul.f32 %v2684_v49, %v961_v53  ;;  %v1062_v49 = vmul.f32 %v2694_v38, %v966_v23 }
 0x303   : > { %950 = vst.msk [vmem:[#allocation3 + $0x38] sm:$0xff] %vm942_vm2, %v933_v41 }
 0x304   : > { %v907_v19 = vpop.xlane.xlu0 %906 }
 0x305   : > { %v913_v9 = vpop.xlane.xlu1 %912  ;;  %v932_v2 = vadd.f32 %v907_v19, %v884_v58  ;;  %v963_v58 = vld [vmem:[#allocation4 + $0x50] sm:$0xff] }
 0x306   : > { %v935_v52 = vadd.f32 %v913_v9, %v887_v0  ;;  %v1059_v19 = vmul.f32 %v2688_v54, %v963_v58 }
 0x307   : > { %949 = vst.msk [vmem:[#allocation3 + $0x30] sm:$0xff] %vm942_vm2, %v932_v2 }
 0x308   : > { %952 = vst.msk [vmem:[#allocation3 + $0x48] sm:$0xff] %vm942_vm2, %v935_v52  ;;  %v911_v47 = vpop.xlane.xlu0 %910  ;;  %v968_v52 = vld [vmem:[#allocation4 + $0x20] sm:$0xff] }
 0x309   : > { %v917_v46 = vpop.xlane.xlu1 %916  ;;  %v934_v10 = vadd.f32 %v911_v47, %v886_v4  ;;  %v1064_v26 = vmul.f32 %v2698_v3, %v968_v52 }
 0x30a   : > { %v937_v6 = vadd.f32 %v917_v46, %v889_v44  ;;  %v1061_v44 = vmul.f32 %v2692_v35, %v965_v25  ;;  %v972_v35 = vld [vmem:[#allocation4 + $0x70] sm:$0xff] }
 0x30b   : > { %951 = vst.msk [vmem:[#allocation3 + $0x40] sm:$0xff] %vm942_vm2, %v934_v10  ;;  %v970_v10 = vld [vmem:[#allocation4 + $0x38] sm:$0xff] }
 0x30c   : > { %954 = vst.msk [vmem:[#allocation3 + $0x58] sm:$0xff] %vm942_vm2, %v937_v6  ;;  %v915_v17 = vpop.xlane.xlu0 %914  ;;  %v1063_v6 = vmul.f32 %v2696_v29, %v967_v39  ;;  %v1066_v38 = vmul.f32 %v2702_v37, %v970_v10 }
 0x30d   : > { %v921_v18 = vpop.xlane.xlu1 %920  ;;  %v936_v22 = vadd.f32 %v915_v17, %v888_v56 }
 0x30e   : > { %v939_v48 = vadd.f32 %v921_v18, %v891_v59  ;;  %v969_v59 = vld [vmem:[#allocation4 + $0x10] sm:$0xff] }
 0x30f   : > { %953 = vst.msk [vmem:[#allocation3 + $0x50] sm:$0xff] %vm942_vm2, %v936_v22  ;;  %v1065_v22 = vmul.f32 %v2700_v31, %v969_v59 }
 0x310   : > { %956 = vst.msk [vmem:[#allocation3 + $0x68] sm:$0xff] %vm942_vm2, %v939_v48  ;;  %v919_v27 = vpop.xlane.xlu0 %918 }
 0x311   : > { %v925_v28 = vpop.xlane.xlu1 %924  ;;  %v938_v42 = vadd.f32 %v919_v27, %v890_v57  ;;  %v1068_v57 = vmul.f32 %v2707_v7, %v972_v35 }
 0x312   : > { %v941_v32 = vadd.f32 %v925_v28, %v893_v61  ;;  %v974_v61 = vld [vmem:[#allocation4 + $0x28] sm:$0xff]  ;;  %v1067_v28 = vmul.f32 %v2704_v55, %v971_v24 }
 0x313   : > { %955 = vst.msk [vmem:[#allocation3 + $0x60] sm:$0xff] %vm942_vm2, %v938_v42  ;;  %v973_v42 = vld [vmem:[#allocation4 + $0x78] sm:$0xff] }
 0x314   : > { %958 = vst.msk [vmem:[#allocation3 + $0x78] sm:$0xff] %vm942_vm2, %v941_v32  ;;  %v923_v33 = vpop.xlane.xlu0 %922 }
 0x315   : > { %v940_v60 = vadd.f32 %v923_v33, %v892_v11  ;;  %v1048_v32 = vpop.permute.xlu1 %1047 }
 0x316   : > { %v1069_v14 = vmul.f32 %v1048_v32, %v973_v42 }
 0x317   : > { %957 = vst.msk [vmem:[#allocation3 + $0x70] sm:$0xff] %vm942_vm2, %v940_v60 }
 0x31c   : > { %v1053_v27 = vpop.permute.xlu0 %1052 }
 0x31d   : > { %v1070_v33 = vmul.f32 %v1053_v27, %v974_v61 }
 0x323   : > { %v1841_v20 = vpop.f32.mrf.mxu1 }
 0x324   : > { %v1233_v15 = vadd.f32 %v1841_v20, %v1056_v63 }
 0x325   : > { %v1153_v45 = vpop.f32.mrf.mxu1 }
 0x326   : > { %1249 = vst [vmem:[#allocation4] sm:$0xff] %v1233_v15  ;;  %v1232_v21 = vadd.f32 %v1153_v45, %v1055_v34 }
 0x328   : > { %1248 = vst [vmem:[#allocation4 + $0x30] sm:$0xff] %v1232_v21 }
 0x32c   : > { %v1844_v8 = vpop.f32.mrf.mxu1 }
 0x32d   : > { %v1235_v1 = vadd.f32 %v1844_v8, %v1058_v62 }
 0x32e   : > { %v1163_v41 = vpop.f32.mrf.mxu1 }
 0x32f   : > { %1251 = vst [vmem:[#allocation4 + $0x18] sm:$0xff] %v1235_v1  ;;  %v1234_v43 = vadd.f32 %v1163_v41, %v1057_v51 }
 0x331   : > { %1250 = vst [vmem:[#allocation4 + $0x58] sm:$0xff] %v1234_v43 }
 0x334   : > { %v1847_v0 = vpop.f32.mrf.mxu1 }
 0x335   : > { %v1237_v50 = vadd.f32 %v1847_v0, %v1060_v36 }
 0x336   : > { %v1173_v9 = vpop.f32.mrf.mxu1 }
 0x337   : > { %1253 = vst [vmem:[#allocation4 + $0x68] sm:$0xff] %v1237_v50  ;;  %v1236_v2 = vadd.f32 %v1173_v9, %v1059_v19 }
 0x339   : > { %1252 = vst [vmem:[#allocation4 + $0x50] sm:$0xff] %v1236_v2 }
 0x33c   : > { %v1850_v4 = vpop.f32.mrf.mxu1 }
 0x33d   : > { %v1239_v47 = vadd.f32 %v1850_v4, %v1062_v49 }
 0x33e   : > { %v1183_v46 = vpop.f32.mrf.mxu1 }
 0x33f   : > { %1255 = vst [vmem:[#allocation4 + $0x48] sm:$0xff] %v1239_v47  ;;  %v1238_v54 = vadd.f32 %v1183_v46, %v1061_v44 }
 0x340   : > { %v1853_v16 = vpop.f32.mrf.mxu1 }
 0x341   : > { %1254 = vst [vmem:[#allocation4 + $0x8] sm:$0xff] %v1238_v54  ;;  %v1241_v56 = vadd.f32 %v1853_v16, %v1064_v26 }
 0x342   : > { %v1193_v17 = vpop.f32.mrf.mxu1 }
 0x343   : > { %1257 = vst [vmem:[#allocation4 + $0x20] sm:$0xff] %v1241_v56  ;;  %v1240_v12 = vadd.f32 %v1193_v17, %v1063_v6 }
 0x344   : > { %v1856_v18 = vpop.f32.mrf.mxu1 }
 0x345   : > { %1256 = vst [vmem:[#allocation4 + $0x40] sm:$0xff] %v1240_v12  ;;  %v1243_v3 = vadd.f32 %v1856_v18, %v1066_v38 }
 0x346   : > { %v1203_v48 = vpop.f32.mrf.mxu1 }
 0x347   : > { %1259 = vst [vmem:[#allocation4 + $0x38] sm:$0xff] %v1243_v3  ;;  %v1242_v29 = vadd.f32 %v1203_v48, %v1065_v22 }
 0x348   : > { %v1859_v13 = vpop.f32.mrf.mxu1 }
 0x349   : > { %1258 = vst [vmem:[#allocation4 + $0x10] sm:$0xff] %v1242_v29  ;;  %v1245_v37 = vadd.f32 %v1859_v13, %v1068_v57 }
 0x34a   : > { %v1213_v11 = vpop.f32.mrf.mxu1 }
 0x34b   : > { %1261 = vst [vmem:[#allocation4 + $0x70] sm:$0xff] %v1245_v37  ;;  %v1244_v31 = vadd.f32 %v1213_v11, %v1067_v28 }
 0x34c   : > { %v1862_v60 = vpop.f32.mrf.mxu1 }
 0x34d   : > { %1260 = vst [vmem:[#allocation4 + $0x60] sm:$0xff] %v1244_v31  ;;  %v1247_v5 = vadd.f32 %v1862_v60, %v1070_v33  ;;  %1283 = sbr.rel (%p1680_p3) target bundleno = 1027 (0x403), region = 40 }
 0x34e   : > { %v1223_v7 = vpop.f32.mrf.mxu1 }
 0x34f   : > { %1263 = vst [vmem:[#allocation4 + $0x28] sm:$0xff] %v1247_v5  ;;  %v1246_v63 = vadd.f32 %v1223_v7, %v1069_v14 }
 0x351   : > { %1262 = vst [vmem:[#allocation4 + $0x78] sm:$0xff] %v1246_v63 }
 0x352   : > { %v1286_v55 = vld [vmem:[#allocation3 + $0x10] sm:$0xff]  ;;  %v1284_v20 = vld [vmem:[#allocation3] sm:$0xff]  ;;  %v1287_v34 = vld [vmem:[#allocation3 + $0x18] sm:$0xff]  ;;  %v2169_v15 = vmov 0  }
 0x353   : > { %2023 = vset.pattern.permute.xlu1 %v2169_v15  ;;  %2022 = vset.pattern.permute.xlu0 %v2169_v15  ;;  %2024 = vrcp.f32 %v1286_v55  ;;  %v1285_v45 = vld [vmem:[#allocation3 + $0x8] sm:$0xff]  ;;  %v1288_v40 = vld [vmem:[#allocation3 + $0x20] sm:$0xff]  ;;  %v1291_v53 = vld [vmem:[#allocation3 + $0x38] sm:$0xff] }
 0x354   : > { %2026 = vrcp.f32 %v1284_v20  ;;  %v1289_v21 = vld [vmem:[#allocation3 + $0x28] sm:$0xff]  ;;  %v1290_v62 = vld [vmem:[#allocation3 + $0x30] sm:$0xff]  ;;  %v1292_v51 = vld [vmem:[#allocation3 + $0x40] sm:$0xff] }
 0x355   : > { %2028 = vrcp.f32 %v1287_v34  ;;  %v1293_v8 = vld [vmem:[#allocation3 + $0x48] sm:$0xff]  ;;  %v1295_v1 = vld [vmem:[#allocation3 + $0x58] sm:$0xff]  ;;  %v1294_v41 = vld [vmem:[#allocation3 + $0x50] sm:$0xff] }
 0x356   : > { %2030 = vrcp.f32 %v1285_v45  ;;  %v1297_v30 = vld [vmem:[#allocation3 + $0x68] sm:$0xff]  ;;  %v1296_v0 = vld [vmem:[#allocation3 + $0x60] sm:$0xff]  ;;  %v1299_v4 = vld [vmem:[#allocation3 + $0x78] sm:$0xff] }
 0x357   : > { %2032 = vrcp.f32 %v1289_v21  ;;  %v1298_v26 = vld [vmem:[#allocation3 + $0x70] sm:$0xff] }
 0x358   : > { %2034 = vrcp.f32 %v1288_v40 }
 0x359   : > { %2036 = vrcp.f32 %v1291_v53 }
 0x35a   : > { %2038 = vrcp.f32 %v1290_v62 }
 0x35b   : > { %2040 = vrcp.f32 %v1293_v8 }
 0x35c   : > { %2042 = vrcp.f32 %v1292_v51 }
 0x35d   : > { %2044 = vrcp.f32 %v1295_v1 }
 0x35e   : > { %2046 = vrcp.f32 %v1294_v41 }
 0x35f   : > { %2048 = vrcp.f32 %v1297_v30 }
 0x360   : > { %v2025_v43 = vpop.eup %2024  ;;  %2050 = vrcp.f32 %v1296_v0 }
 0x361   : > { %v2027_v58 = vpop.eup %2026  ;;  %v1318_v36 = vmul.f32 %v2025_v43, %v1286_v55  ;;  %2052 = vrcp.f32 %v1299_v4 }
 0x362   : > { %v2029_v19 = vpop.eup %2028  ;;  %v1316_v50 = vmul.f32 %v2027_v58, %v1284_v20  ;;  %2054 = vrcp.f32 %v1298_v26 }
 0x363   : > { %v2031_v9 = vpop.eup %2030  ;;  %v1334_v2 = vsub.f32 2.0, %v1318_v36  ;;  %v1319_v23 = vmul.f32 %v2029_v19, %v1287_v34 }
 0x364   : > { %v2033_v25 = vpop.eup %2032  ;;  %v1332_v49 = vsub.f32 2.0, %v1316_v50  ;;  %v1317_v52 = vmul.f32 %v2031_v9, %v1285_v45 }
 0x365   : > { %v2035_v44 = vpop.eup %2034  ;;  %v1350_v47 = vmul.f32 %v2025_v43, %v1334_v2  ;;  %v1335_v39 = vsub.f32 2.0, %v1319_v23  ;;  %v1321_v46 = vmul.f32 %v2033_v25, %v1289_v21 }
 0x366   : > { %v2037_v54 = vpop.eup %2036  ;;  %v1348_v10 = vmul.f32 %v2027_v58, %v1332_v49  ;;  %v1333_v16 = vsub.f32 2.0, %v1317_v52  ;;  %v1320_v6 = vmul.f32 %v2035_v44, %v1288_v40  ;;  %v1365_v49 = vld [vmem:[#allocation4] sm:$0xff] }
 0x367   : > { %v2039_v56 = vpop.eup %2038  ;;  %1392 = vperm.xlu1 %2023, %v1350_v47   ;;  %v1351_v59 = vmul.f32 %v2029_v19, %v1335_v39  ;;  %v1337_v17 = vsub.f32 2.0, %v1321_v46  ;;  %v1323_v38 = vmul.f32 %v2037_v54, %v1291_v53  ;;  %v1364_v19 = vld [vmem:[#allocation4 + $0x30] sm:$0xff]  ;;  %v1369_v39 = vld [vmem:[#allocation4 + $0x68] sm:$0xff] }
 0x368   : > { %v2041_v12 = vpop.eup %2040  ;;  %1382 = vperm.xlu0 %2022, %v1348_v10   ;;  %v1349_v35 = vmul.f32 %v2031_v9, %v1333_v16  ;;  %v1336_v18 = vsub.f32 2.0, %v1320_v6  ;;  %v1322_v22 = vmul.f32 %v2039_v56, %v1290_v62  ;;  %v1368_v46 = vld [vmem:[#allocation4 + $0x50] sm:$0xff]  ;;  %v1371_v6 = vld [vmem:[#allocation4 + $0x48] sm:$0xff] }
 0x369   : > { %v2043_v3 = vpop.eup %2042  ;;  %v1353_v24 = vmul.f32 %v2033_v25, %v1337_v17  ;;  %v1339_v48 = vsub.f32 2.0, %v1323_v38  ;;  %v1325_v57 = vmul.f32 %v2041_v12, %v1293_v8  ;;  %v1367_v25 = vld [vmem:[#allocation4 + $0x18] sm:$0xff] }
 0x36a   : > { %v2045_v29 = vpop.eup %2044  ;;  %v1352_v61 = vmul.f32 %v2035_v44, %v1336_v18  ;;  %v1338_v27 = vsub.f32 2.0, %v1322_v22  ;;  %v1324_v13 = vmul.f32 %v2043_v3, %v1292_v51  ;;  %v1372_v18 = vld [vmem:[#allocation4 + $0x40] sm:$0xff] }
 0x36b   : > { %1397 = vperm.xlu1 %2023, %v1351_v59   ;;  %v2047_v28 = vpop.eup %2046  ;;  %v1355_v37 = vmul.f32 %v2037_v54, %v1339_v48  ;;  %v1341_v42 = vsub.f32 2.0, %v1325_v57  ;;  %v1327_v32 = vmul.f32 %v2045_v29, %v1295_v1  ;;  %v1375_v57 = vld [vmem:[#allocation4 + $0x38] sm:$0xff] }
 0x36c   : > { %1387 = vperm.xlu0 %2022, %v1349_v35   ;;  %v2049_v11 = vpop.eup %2048  ;;  %v1354_v33 = vmul.f32 %v2039_v56, %v1338_v27  ;;  %v1340_v31 = vsub.f32 2.0, %v1324_v13  ;;  %v1326_v60 = vmul.f32 %v2047_v28, %v1294_v41  ;;  %v1370_v56 = vld [vmem:[#allocation4 + $0x8] sm:$0xff]  ;;  %v1373_v35 = vld [vmem:[#allocation4 + $0x20] sm:$0xff] }
 0x36d   : > { %v2051_v14 = vpop.eup %2050  ;;  %v1357_v5 = vmul.f32 %v2041_v12, %v1341_v42  ;;  %v1343_v7 = vsub.f32 2.0, %v1327_v32  ;;  %v1329_v63 = vmul.f32 %v2049_v11, %v1297_v30  ;;  %v1376_v42 = vld [vmem:[#allocation4 + $0x60] sm:$0xff] }
 0x36e   : > { %v2053_v55 = vpop.eup %2052  ;;  %v1356_v20 = vmul.f32 %v2043_v3, %v1340_v31  ;;  %v1342_v34 = vsub.f32 2.0, %v1326_v60  ;;  %v1328_v15 = vmul.f32 %v2051_v14, %v1296_v0  ;;  %v1366_v0 = vld [vmem:[#allocation4 + $0x58] sm:$0xff]  ;;  %v1379_v60 = vld [vmem:[#allocation4 + $0x28] sm:$0xff] }
 0x36f   : > { %1407 = vperm.xlu1 %2023, %v1353_v24   ;;  %v2055_v45 = vpop.eup %2054  ;;  %v1359_v21 = vmul.f32 %v2045_v29, %v1343_v7  ;;  %v1345_v40 = vsub.f32 2.0, %v1329_v63  ;;  %v1331_v53 = vmul.f32 %v2053_v55, %v1299_v4  ;;  %v1374_v29 = vld [vmem:[#allocation4 + $0x10] sm:$0xff] }
 0x370   : > { %1402 = vperm.xlu0 %2022, %v1352_v61   ;;  %v1358_v62 = vmul.f32 %v2047_v28, %v1342_v34  ;;  %v1344_v8 = vsub.f32 2.0, %v1328_v15  ;;  %v1330_v51 = vmul.f32 %v2055_v45, %v1298_v26 }
 0x371   : > { %v1361_v1 = vmul.f32 %v2049_v11, %v1345_v40  ;;  %v1347_v41 = vsub.f32 2.0, %v1331_v53 }
 0x372   : > { %v1360_v43 = vmul.f32 %v2051_v14, %v1344_v8  ;;  %v1346_v30 = vsub.f32 2.0, %v1330_v51  ;;  %v1378_v14 = vld [vmem:[#allocation4 + $0x78] sm:$0xff] }
 0x373   : > { %1417 = vperm.xlu1 %2023, %v1355_v37   ;;  %v1363_v58 = vmul.f32 %v2053_v55, %v1347_v41  ;;  %v1377_v37 = vld [vmem:[#allocation4 + $0x70] sm:$0xff] }
 0x374   : > { %1412 = vperm.xlu0 %2022, %v1354_v33   ;;  %v1362_v36 = vmul.f32 %v2055_v45, %v1346_v30 }
 0x377   : > { %1427 = vperm.xlu1 %2023, %v1357_v5  }
 0x378   : > { %1422 = vperm.xlu0 %2022, %v1356_v20  }
 0x37b   : > { %1437 = vperm.xlu1 %2023, %v1359_v21  }
 0x37c   : > { %1432 = vperm.xlu0 %2022, %v1358_v62  }
 0x37f   : > { %1447 = vperm.xlu1 %2023, %v1361_v1  }
 0x380   : > { %1442 = vperm.xlu0 %2022, %v1360_v43  }
 0x383   : > { %1457 = vperm.xlu1 %2023, %v1363_v58  }
 0x384   : > { %1452 = vperm.xlu0 %2022, %v1362_v36  }
 0x3e2   : > { %v1393_v50 = vpop.permute.xlu1 %1392 }
 0x3e3   : > { %v1462_v9 = vmul.f32 %v1393_v50, %v1366_v0  ;;  %v1383_v2 = vpop.permute.xlu0 %1382 }
 0x3e4   : > { %v1460_v23 = vmul.f32 %v1383_v2, %v1364_v19 }
 0x3e5   : > { %1478 = vst [vmem:[%s2304_s11 + $0x10] sm:$0xff] %v1462_v9 }
 0x3e6   : > { %1476 = vst [vmem:[%s2304_s11] sm:$0xff] %v1460_v23  ;;  %v1398_v52 = vpop.permute.xlu1 %1397 }
 0x3e7   : > { %v1463_v4 = vmul.f32 %v1398_v52, %v1367_v25  ;;  %v1388_v44 = vpop.permute.xlu0 %1387 }
 0x3e8   : > { %v1461_v47 = vmul.f32 %v1388_v44, %v1365_v49 }
 0x3e9   : > { %1479 = vst [vmem:[%s2304_s11 + $0x18] sm:$0xff] %v1463_v4 }
 0x3ea   : > { %1477 = vst [vmem:[%s2304_s11 + $0x8] sm:$0xff] %v1461_v47  ;;  %v1408_v26 = vpop.permute.xlu1 %1407 }
 0x3eb   : > { %v1465_v54 = vmul.f32 %v1408_v26, %v1369_v39  ;;  %v1403_v10 = vpop.permute.xlu0 %1402 }
 0x3ec   : > { %v1464_v16 = vmul.f32 %v1403_v10, %v1368_v46 }
 0x3ed   : > { %1481 = vst [vmem:[%s2304_s11 + $0x28] sm:$0xff] %v1465_v54 }
 0x3ee   : > { %1480 = vst [vmem:[%s2304_s11 + $0x20] sm:$0xff] %v1464_v16  ;;  %v1418_v59 = vpop.permute.xlu1 %1417 }
 0x3ef   : > { %v1467_v17 = vmul.f32 %v1418_v59, %v1371_v6  ;;  %v1413_v38 = vpop.permute.xlu0 %1412 }
 0x3f0   : > { %v1466_v12 = vmul.f32 %v1413_v38, %v1370_v56 }
 0x3f1   : > { %1483 = vst [vmem:[%s2304_s11 + $0x38] sm:$0xff] %v1467_v17 }
 0x3f2   : > { %1482 = vst [vmem:[%s2304_s11 + $0x30] sm:$0xff] %v1466_v12  ;;  %v1428_v22 = vpop.permute.xlu1 %1427 }
 0x3f3   : > { %v1469_v3 = vmul.f32 %v1428_v22, %v1373_v35  ;;  %v1423_v24 = vpop.permute.xlu0 %1422 }
 0x3f4   : > { %v1468_v48 = vmul.f32 %v1423_v24, %v1372_v18 }
 0x3f5   : > { %1485 = vst [vmem:[%s2304_s11 + $0x48] sm:$0xff] %v1469_v3 }
 0x3f6   : > { %1484 = vst [vmem:[%s2304_s11 + $0x40] sm:$0xff] %v1468_v48  ;;  %v1438_v61 = vpop.permute.xlu1 %1437 }
 0x3f7   : > { %v1471_v27 = vmul.f32 %v1438_v61, %v1375_v57  ;;  %v1433_v13 = vpop.permute.xlu0 %1432 }
 0x3f8   : > { %v1470_v28 = vmul.f32 %v1433_v13, %v1374_v29 }
 0x3f9   : > { %1487 = vst [vmem:[%s2304_s11 + $0x58] sm:$0xff] %v1471_v27 }
 0x3fa   : > { %1486 = vst [vmem:[%s2304_s11 + $0x50] sm:$0xff] %v1470_v28  ;;  %v1448_v32 = vpop.permute.xlu1 %1447 }
 0x3fb   : > { %v1473_v11 = vmul.f32 %v1448_v32, %v1377_v37  ;;  %v1443_v33 = vpop.permute.xlu0 %1442 }
 0x3fc   : > { %v1472_v31 = vmul.f32 %v1443_v33, %v1376_v42 }
 0x3fd   : > { %1489 = vst [vmem:[%s2304_s11 + $0x68] sm:$0xff] %v1473_v11 }
 0x3fe   : > { %1488 = vst [vmem:[%s2304_s11 + $0x60] sm:$0xff] %v1472_v31  ;;  %v1458_v5 = vpop.permute.xlu1 %1457 }
 0x3ff   : > { %v1475_v7 = vmul.f32 %v1458_v5, %v1379_v60  ;;  %v1453_v63 = vpop.permute.xlu0 %1452 }
 0x400   : > { %v1474_v55 = vmul.f32 %v1453_v63, %v1378_v14 }
 0x401   : > { %1491 = vst [vmem:[%s2304_s11 + $0x78] sm:$0xff] %v1475_v7 }
 0x402   : > { %1490 = vst [vmem:[%s2304_s11 + $0x70] sm:$0xff] %v1474_v55 }
 0x403 PF: > { %s1683_s15 = sshll.u32 %s2148_s17, 5  ;;  %s1508_s19 = sshll.u32 %s2304_s11, 4  ;;  %s2774_s19 = int_to_ptr.vmem [resolvable:$true] %s1508_s19 }
 0x404   : > { %s1505_s18 = sadd.s32 %s1683_s15, %s2280_s8  ;;  %s2858_s7 = sand.u32 1, %s2132_s13  }
 0x405   : > { %s1684_s20 = sshll.u32 %s1505_s18, 7  ;;  %s2783_s9 = scalar_lea.sflag [#allocation6], %s2858_s7 }
 0x406   : > { %s2779_s26 = scalar_lea.hbm %s2843_s3, %s1684_s20  ;;  %s2056_s22 = scalar_lea.vmem %s2774_s19, 2048 }
 0x407   : > { %p2057_p4 = scmp.ne.s32.totalorder %s2774_s19, %s2056_s22  ;;  %s2170_s17 = smov [#allocation5]  }
 0x408   : > { %s2060_s8 = sshll.u32 %s2170_s17, 4  ;;  %s2061_s8 = int_to_ptr.vmem [resolvable:$false] %s2060_s8 }
 0x409   : > { %p2058_p5 = pnand %p2057_p4, %p2255_p6  ;;  %s2062_s23 = scalar_lea.vmem %s2061_s8, 4096 }
 0x40a   : > { %p2063_p9 = scmp.lt.s32.totalorder %s2774_s19, %s2061_s8  ;;  %p2064_p10 = scmp.lt.s32.totalorder %s2062_s23, %s2056_s22 }
 0x40b   : > { %p2059_p8 = pneg %p2058_p5 }
 0x40c   : > { %p2065_p11 = por %p2064_p10, %p2063_p9 }
 0x40e   : > { %p2066_p12 = pnand %p2065_p11, %p2059_p8 }
 0x410   : > { %2069 = shalt.err (!%p2066_p12)
}
 0x411   : > { %s2070_s29 = scalar_lea.hbm %s2779_s26, 2048  ;;  %s2074_s5 = scalar_lea.hbm %s2843_s3, 32768 }
 0x412   : > { %p2071_p13 = scmp.ne.s32.totalorder %s2779_s26, %s2070_s29  ;;  %p2075_p2 = scmp.lt.s32.totalorder %s2779_s26, %s2843_s3 }
 0x413   : > { %p2076_p3 = scmp.lt.s32.totalorder %s2074_s5, %s2070_s29 }
 0x414   : > { %p2072_p0 = pnand %p2071_p13, %p2255_p6 }
 0x415   : > { %p2077_p4 = por %p2076_p3, %p2075_p2 }
 0x416   : > { %p2073_p1 = pneg %p2072_p0 }
 0x418   : > { %p2078_p5 = pnand %p2077_p4, %p2073_p1 }
 0x41a   : > { %2081 = shalt.err (!%p2078_p5)
}
 0x41b   : > { %s2171_s11 = smov 128   ;;  %s2172_s15 = smov 8  }
 0x41c   : > { %1863 = dma.vmem_to_hbm [thread:$0]  (%p2255_p6), %s2774_s19, 2048, %s2779_s26, %s2783_s9, %s2171_s11, %s2171_s11, %s2172_s15  }
 0x41d PF: > { %p1869_p8 = scmp.ge.s32.totalorder %s2164_s21, 2  ;;  %s1523_s18 = sand.u32 1, %s2128_s12  }
 0x41e   : > { %s1524_s20 = scalar_lea.sflag [#allocation6], %s1523_s18 }
 0x41f   : > { %p1866_p9 = pnand %p1869_p8, %p2262_p7 }
 0x421   : > { %p1867_p10 = pneg %p1866_p9 }
 0x423   : > { %2123 = dma.done.wait (%p1867_p10), %s1524_s20, 2048  }
 0x424   : > { %2125 = vsyncadd (%p1867_p10), %s1524_s20, 4294965248  ;;  %s16_s21 = sadd.s32 1, %s2164_s21   ;;  %s2859_s15 = sld [smem:[#allocation8_spill]] }
 0x425   : > { %p13_p11 = scmp.ge.s32.totalorder %s16_s21, 34   ;;  %s2860_s16 = sld [smem:[#allocation9_spill]] }
 0x426   : > { %s2861_s17 = sld [smem:[#allocation10_spill]]  ;;  %s2865_s12 = smov %s2132_s13 }
 0x427   : > { %s2862_s18 = sld [smem:[#allocation11_spill]]  ;;  %s2866_s13 = smov %s2136_s14 }
 0x428   : > { %s2863_s19 = sld [smem:[#allocation12_spill]]  ;;  %s2867_s14 = smov %s2276_s6 }
 0x429   : > { %s2864_s20 = sld [smem:[#allocation13_spill]]  ;;  %15 = sbr.rel (!%p13_p11) target bundleno = 6 (0x6), region = 81 }
 0x42e   :  { %1529 = vsyncpa [#allocation6], 1 }
 0x42f   :  { %1531 = vsyncpa [#allocation6 + $0x1], 1 }

</bundles_post_ra>
